<compile_context>
chip_gen: v7x
topology: tpu7x:2x2x1
jax: 0.10.0
libtpu: 0.0.40
codegen_flags: <defaults>
</compile_context>

<pallas_src>
import jax
import jax.numpy as jnp
from jax.experimental import pallas as pl
from jax.experimental.pallas import tpu as pltpu


# ---------------------------------------------------------------------------
# Kernels
# ---------------------------------------------------------------------------
def _fused_mlp_kernel(x_ref, w1_ref, b1_ref, w2_ref, b2_ref, w3_ref, b3_ref,
                      out_ref, acc_ref):
    """S == 1 path: stream K tiles of x @ W1 into a resident f32 accumulator,
    then run the whole epilogue (bias+ReLU -> fc2 -> ReLU -> fc3) on the
    last K step.  Grid is (KT,) = K tiles ("arbitrary" reduction)."""
    k = pl.program_id(0)

    @pl.when(k == 0)
    def _():
        acc_ref[...] = jnp.zeros_like(acc_ref)

    acc_ref[...] += jnp.dot(
        x_ref[...], w1_ref[...], preferred_element_type=jnp.float32
    )

    @pl.when(k == pl.num_programs(0) - 1)
    def _():
        h1 = jnp.maximum(acc_ref[...] + b1_ref[...], 0.0)               # (B,128)
        h2 = jnp.maximum(
            jnp.dot(h1, w2_ref[...], preferred_element_type=jnp.float32)
            + b2_ref[...],
            0.0,
        )                                                               # (B,64)
        out = (
            jnp.dot(h2, w3_ref[...], preferred_element_type=jnp.float32)
            + b3_ref[...]
        )                                                               # (B,3)
        out_ref[...] = out.astype(out_ref.dtype)


def _fc1_partial_kernel(x_ref, w1_ref, out_ref):
    """S > 1 path, phase 1: accumulate one K-tile of x @ W1 directly into the
    resident (B, 128) output block for split `s`.

    Grid is (S, KT): S = number of K-splits ("parallel" -> both TCs on v7x),
    KT = K-tiles per split ("arbitrary" reduction).  The output block index
    is k-invariant, so it stays VMEM-resident across the reduction -- no
    scratch accumulator and no final copy needed.
    """
    k = pl.program_id(1)

    @pl.when(k == 0)
    def _():
        out_ref[...] = jnp.zeros_like(out_ref)

    out_ref[...] += jnp.dot(
        x_ref[...], w1_ref[...], preferred_element_type=jnp.float32
    )


def _epilogue_kernel(part_ref, b1_ref, w2_ref, b2_ref, w3_ref, b3_ref, out_ref):
    """S > 1 path, phase 2: sum per-split fc1 partials, then
    bias+ReLU -> fc2 -> ReLU -> fc3.  Everything resident in VMEM."""
    h1 = jnp.maximum(jnp.sum(part_ref[...], axis=0) + b1_ref[...], 0.0)   # (B,128)
    h2 = jnp.maximum(
        jnp.dot(h1, w2_ref[...], preferred_element_type=jnp.float32)
        + b2_ref[...],
        0.0,
    )                                                                     # (B,64)
    out = (
        jnp.dot(h2, w3_ref[...], preferred_element_type=jnp.float32)
        + b3_ref[...]
    )                                                                     # (B,3)
    out_ref[...] = out.astype(out_ref.dtype)


# ---------------------------------------------------------------------------
# Tile / config selection
# ---------------------------------------------------------------------------
def _pick_tile(per_split_k, tk_req):
    """Largest multiple of 128 that divides per_split_k and is <= tk_req.

    Searches ALL divisors (not just power-of-2 halvings), so non-power-of-2
    feature dims such as 1,351,680 = 128 * 2^6*3*5*11 still get big tiles
    (e.g. request 16384 -> tk 15360)."""
    assert per_split_k % 128 == 0, (
        f"per-split feature dim must be a multiple of 128, got {per_split_k}"
    )
    d_total = per_split_k // 128
    d_req = max(1, min(tk_req // 128, d_total))
    best, d = 1, 1
    while d * d <= d_total:
        if d_total % d == 0:
            for cand in (d, d_total // d):
                if best < cand <= d_req:
                    best = cand
        d += 1
    return best * 128


def _default_config():
    """Per-generation defaults (tile sizes keep double-buffered inputs inside
    the default scoped VMEM: v5e 16 MiB, v6e/v7x 32 MiB)."""
    kind = ""
    try:
        kind = jax.devices()[0].device_kind.lower()
    except Exception:  # pragma: no cover - defensive
        pass
    if "v7" in kind:
        # 2 TensorCores: split the W1 stream; tk=16384 f32 -> ~16.5 MiB
        # double-buffered per core path, fine under 32 MiB scoped / 64 phys.
        return {"tk": 16384, "num_k_splits": 2}
    if "v6" in kind:
        # Single TC: the split buys nothing; big tiles amortize step overhead.
        return {"tk": 16384, "num_k_splits": 1}
    if "v5" in kind:
        # 16 MiB default scoped VMEM: tk=8192 -> ~8.3 MiB double-buffered.
        return {"tk": 8192, "num_k_splits": 1}
    return {"tk": 8192, "num_k_splits": 1}  # conservative fallback


# ---------------------------------------------------------------------------
# Wrapper
# ---------------------------------------------------------------------------
def temporal_order_model(x, params, *, tk=None, num_k_splits=None,
                         stream_bf16=False, w1_buffers=None,
                         split_core_parallel=False):
    """Forward pass. x: (B, K) f32. params: w1 (K,128), b1 (1,128), w2, b2,
    w3, b3 (weights transposed vs PyTorch nn.Linear)."""
    cfg = _default_config()
    if tk is None:
        tk = cfg["tk"]
    if num_k_splits is None:
        num_k_splits = cfg["num_k_splits"]

    w1, b1 = params["w1"], params["b1"]
    w2, b2 = params["w2"], params["b2"]
    w3, b3 = params["w3"], params["b3"]

    B, K = x.shape
    H1 = w1.shape[1]   # 128
    H2 = w2.shape[1]   # 64
    C = w3.shape[1]    # 3

    # TODO(synk): K not divisible by 128 would need a zero-padded tail tile.
    assert K % 128 == 0, "feature dim must be a multiple of 128"

    S = num_k_splits
    if S < 1 or K % S != 0 or (K // S) % 128 != 0:
        S = 1   # NOTE: silently drops the multi-TC split if K doesn't divide.
    per_split_k = K // S
    tk = _pick_tile(per_split_k, tk)
    kt = per_split_k // tk          # reduction trip count per split

    if stream_bf16:
        # Numerics-policy option: halves the dominant W1 HBM stream (f32
        # accumulation preserved via preferred_element_type).  W1 should be
        # STORED in bf16 by the caller -- a per-call cast here would re-read
        # and re-write all of W1 and negate the benefit.
        if w1.dtype != jnp.bfloat16:
            w1 = w1.astype(jnp.bfloat16)
        x = x.astype(jnp.bfloat16)

    # Optional third buffer on the perfectly-regular W1 stream (secondary
    # lever after tile size; sweep on hardware).
    w1_spec_kwargs = {}
    if w1_buffers is not None and w1_buffers != 2:
        w1_spec_kwargs["pipeline_mode"] = pl.Buffered(w1_buffers)

    if S == 1:
        # --- fully fused single kernel (v5e / v6e default) ----------------
        # VMEM (double-buffered inputs): 2*(tk*H1 + B*tk)*4B
        #   tk=8192  -> ~8.3 MiB   (fits v5e's 16 MiB scoped default)
        #   tk=16384 -> ~16.5 MiB  (fits v6e/v7x's 32 MiB scoped default)
        # plus ~80 KiB of resident small weights/biases.
        w1_spec = pl.BlockSpec((tk, H1), lambda k: (k, 0), **w1_spec_kwargs)
        return pl.pallas_call(
            _fused_mlp_kernel,
            out_shape=jax.ShapeDtypeStruct((B, C), jnp.float32),
            grid_spec=pltpu.PrefetchScalarGridSpec(
                num_scalar_prefetch=0,
                grid=(kt,),
                in_specs=[
                    pl.BlockSpec((B, tk), lambda k: (0, k)),     # x tile
                    w1_spec,                                      # W1 tile
                    pl.BlockSpec((1, H1), lambda k: (0, 0)),      # b1 (resident)
                    pl.BlockSpec((H1, H2), lambda k: (0, 0)),     # w2 (resident)
                    pl.BlockSpec((1, H2), lambda k: (0, 0)),      # b2 (resident)
                    pl.BlockSpec((H2, C), lambda k: (0, 0)),      # w3 (resident)
                    pl.BlockSpec((1, C), lambda k: (0, 0)),       # b3 (resident)
                ],
                out_specs=pl.BlockSpec((B, C), lambda k: (0, 0)),
                scratch_shapes=[pltpu.VMEM((B, H1), jnp.float32)],
            ),
            compiler_params=pltpu.CompilerParams(
                dimension_semantics=(pltpu.ARBITRARY,),
            ),
        )(x, w1, b1, w2, b2, w3, b3)

    # --- phase 1: fc1 partial pre-activations, streamed from HBM ----------
    split_sem = pltpu.CORE_PARALLEL if split_core_parallel else pltpu.PARALLEL
    w1_spec = pl.BlockSpec(
        (tk, H1), lambda s, k: (s * kt + k, 0), **w1_spec_kwargs
    )
    partials = pl.pallas_call(
        _fc1_partial_kernel,
        out_shape=jax.ShapeDtypeStruct((S, B, H1), jnp.float32),
        grid_spec=pltpu.PrefetchScalarGridSpec(
            num_scalar_prefetch=0,
            grid=(S, kt),
            in_specs=[
                pl.BlockSpec((B, tk), lambda s, k: (0, s * kt + k)),   # x tile
                w1_spec,                                                # W1 tile
            ],
            # Leading dim squeezed -> kernel accumulates straight into the
            # resident (B, H1) output block (no scratch, no final copy).
            out_specs=pl.BlockSpec((None, B, H1), lambda s, k: (s, 0, 0)),
        ),
        compiler_params=pltpu.CompilerParams(
            # split axis: parallel (intended to shard across v7x TCs);
            # K-tile axis: reduction with resident output accumulator.
            dimension_semantics=(split_sem, pltpu.ARBITRARY),
        ),
    )(x, w1)

    # --- phase 2: tiny cross-split reduce + epilogue (all-VMEM) -----------
    vmem_spec = pl.BlockSpec(memory_space=pltpu.MemorySpace.VMEM)
    out = pl.pallas_call(
        _epilogue_kernel,
        out_shape=jax.ShapeDtypeStruct((B, C), jnp.float32),
        in_specs=[vmem_spec] * 6,
        out_specs=vmem_spec,
    )(partials, b1, w2, b2, w3, b3)
    return out


# ---------------------------------------------------------------------------
# Params / reference
# ---------------------------------------------------------------------------
def init_params(key, input_size, h1=128, h2=64, out=3):
    """Deterministic init matching the module's layer shapes (W transposed)."""
    k1, k2, k3, k4, k5, k6 = jax.random.split(key, 6)

    def u(k, shape, fan_in):
        bound = 1.0 / jnp.sqrt(fan_in)
        return jax.random.uniform(k, shape, jnp.float32, -bound, bound)

    return {
        "w1": u(k1, (input_size, h1), input_size),
        "b1": u(k2, (1, h1), input_size),
        "w2": u(k3, (h1, h2), h1),
        "b2": u(k4, (1, h2), h1),
        "w3": u(k5, (h2, out), h2),
        "b3": u(k6, (1, out), h2),
    }


def reference_forward(x, p):
    h1 = jnp.maximum(x @ p["w1"] + p["b1"], 0.0)
    h2 = jnp.maximum(h1 @ p["w2"] + p["b2"], 0.0)
    return h2 @ p["w3"] + p["b3"]


if __name__ == "__main__":
    # Small stand-in for the original input_size = 8*44*64*60 (= 1,351,680).
    B = 4
    INPUT_SIZE = 8192

    key = jax.random.PRNGKey(0)
    kx, kp = jax.random.split(key)

    x = jax.random.normal(kx, (B, INPUT_SIZE), dtype=jnp.float32)
    params = init_params(kp, INPUT_SIZE)
    ref = reference_forward(x, params)

    # Fused single-kernel path (v5e/v6e config): 4 K-steps, resident acc,
    # in-kernel epilogue.
    out_fused = jax.block_until_ready(
        temporal_order_model(x, params, tk=2048, num_k_splits=1))
    # Two-phase split path (v7x 2-TC config): per-split partials + epilogue.
    out_split = jax.block_until_ready(
        temporal_order_model(x, params, tk=2048, num_k_splits=2))
    # Device-default config (exercises the divisor-aware tile picker).
    out_auto = jax.block_until_ready(temporal_order_model(x, params))

    for out in (out_fused, out_split, out_auto):
        assert out.shape == (B, 3)
        assert jnp.allclose(out, ref, atol=2e-3, rtol=1e-3)

    print("KERNEL_OK")
</pallas_src>

<mosaic_0001>
module attributes {stable_mosaic.version = 11 : i64} {
  func.func @_fused_mlp_kernel(%arg0: i32, %arg1: memref<4x2048xf32, #tpu.memory_space<vmem>>, %arg2: memref<2048x128xf32, #tpu.memory_space<vmem>>, %arg3: memref<1x128xf32, #tpu.memory_space<vmem>>, %arg4: memref<128x64xf32, #tpu.memory_space<vmem>>, %arg5: memref<1x64xf32, #tpu.memory_space<vmem>>, %arg6: memref<64x3xf32, #tpu.memory_space<vmem>>, %arg7: memref<1x3xf32, #tpu.memory_space<vmem>>, %arg8: memref<4x3xf32, #tpu.memory_space<vmem>>, %arg9: memref<4x128xf32, #tpu.memory_space<vmem>>) attributes {dimension_semantics = [#tpu.dimension_semantics<arbitrary>], iteration_bounds = array<i64: 4>, scalar_prefetch = 0 : i64, scratch_operands = 1 : i64, tpu.core_type = #tpu.core_type<tc>, window_params = [{transform_indices = @transform_0, window_bounds = array<i64: 4, 2048>}, {transform_indices = @transform_1, window_bounds = array<i64: 2048, 128>}, {pipeline_mode = #tpu.pipeline_mode<synchronous>, transform_indices = @transform_2, window_bounds = array<i64: 1, 128>}, {pipeline_mode = #tpu.pipeline_mode<synchronous>, transform_indices = @transform_3, window_bounds = array<i64: 128, 64>}, {pipeline_mode = #tpu.pipeline_mode<synchronous>, transform_indices = @transform_4, window_bounds = array<i64: 1, 64>}, {pipeline_mode = #tpu.pipeline_mode<synchronous>, transform_indices = @transform_5, window_bounds = array<i64: 64, 3>}, {pipeline_mode = #tpu.pipeline_mode<synchronous>, transform_indices = @transform_6, window_bounds = array<i64: 1, 3>}, {pipeline_mode = #tpu.pipeline_mode<synchronous>, transform_indices = @transform_7, window_bounds = array<i64: 4, 3>}]} {
    %c0_i32 = arith.constant 0 : i32
    %0 = arith.cmpi eq, %arg0, %c0_i32 : i32
    %1 = arith.extui %0 : i1 to i32
    %c0_i32_0 = arith.constant 0 : i32
    %2 = arith.cmpi ne, %1, %c0_i32_0 : i32
    scf.if %2 {
      %cst_9 = arith.constant 0.000000e+00 : f32
      %12 = vector.broadcast %cst_9 : f32 to vector<4x128xf32>
      %c0_10 = arith.constant 0 : index
      %c0_11 = arith.constant 0 : index
      %13 = vector.load %arg9[%c0_10, %c0_11] : memref<4x128xf32, #tpu.memory_space<vmem>>, vector<4x128xf32>
      tpu.vector_store %arg9[%c0_10, %c0_11], %12 {strides = array<i32>} : memref<4x128xf32, #tpu.memory_space<vmem>>, vector<4x128xf32>,
    } else {
    }
    %c0 = arith.constant 0 : index
    %c0_1 = arith.constant 0 : index
    %3 = vector.load %arg9[%c0, %c0_1] : memref<4x128xf32, #tpu.memory_space<vmem>>, vector<4x128xf32>
    %c0_2 = arith.constant 0 : index
    %c0_3 = arith.constant 0 : index
    %4 = vector.load %arg1[%c0_2, %c0_3] : memref<4x2048xf32, #tpu.memory_space<vmem>>, vector<4x2048xf32>
    %c0_4 = arith.constant 0 : index
    %c0_5 = arith.constant 0 : index
    %5 = vector.load %arg2[%c0_4, %c0_5] : memref<2048x128xf32, #tpu.memory_space<vmem>>, vector<2048x128xf32>
    %cst = arith.constant dense<0.000000e+00> : vector<4x128xf32>
    %6 = tpu.matmul %4, %5, %cst {dimension_numbers = #tpu.dot_dimension_numbers<[1], [0], [0], [1], [0, 0, 1, 1], [], []>} : vector<4x2048xf32>, vector<2048x128xf32>, vector<4x128xf32> -> vector<4x128xf32>
    %7 = arith.addf %3, %6 : vector<4x128xf32>
    %c0_6 = arith.constant 0 : index
    %c0_7 = arith.constant 0 : index
    %8 = vector.load %arg9[%c0_6, %c0_7] : memref<4x128xf32, #tpu.memory_space<vmem>>, vector<4x128xf32>
    tpu.vector_store %arg9[%c0_6, %c0_7], %7 {strides = array<i32>} : memref<4x128xf32, #tpu.memory_space<vmem>>, vector<4x128xf32>,
    %c3_i32 = arith.constant 3 : i32
    %9 = arith.cmpi eq, %arg0, %c3_i32 : i32
    %10 = arith.extui %9 : i1 to i32
    %c0_i32_8 = arith.constant 0 : i32
    %11 = arith.cmpi ne, %10, %c0_i32_8 : i32
    scf.if %11 {
      %c0_9 = arith.constant 0 : index
      %c0_10 = arith.constant 0 : index
      %12 = vector.load %arg9[%c0_9, %c0_10] : memref<4x128xf32, #tpu.memory_space<vmem>>, vector<4x128xf32>
      %c0_11 = arith.constant 0 : index
      %c0_12 = arith.constant 0 : index
      %13 = vector.load %arg3[%c0_11, %c0_12] : memref<1x128xf32, #tpu.memory_space<vmem>>, vector<1x128xf32>
      %14 = vector.broadcast %13 : vector<1x128xf32> to vector<4x128xf32>
      %15 = arith.addf %12, %14 : vector<4x128xf32>
      %cst_13 = arith.constant 0.000000e+00 : f32
      %16 = vector.broadcast %cst_13 : f32 to vector<4x128xf32>
      %17 = arith.maximumf %15, %16 : vector<4x128xf32>
      %c0_14 = arith.constant 0 : index
      %c0_15 = arith.constant 0 : index
      %18 = vector.load %arg4[%c0_14, %c0_15] : memref<128x64xf32, #tpu.memory_space<vmem>>, vector<128x64xf32>
      %cst_16 = arith.constant dense<0.000000e+00> : vector<4x64xf32>
      %19 = tpu.matmul %17, %18, %cst_16 {dimension_numbers = #tpu.dot_dimension_numbers<[1], [0], [0], [1], [0, 0, 1, 1], [], []>} : vector<4x128xf32>, vector<128x64xf32>, vector<4x64xf32> -> vector<4x64xf32>
      %c0_17 = arith.constant 0 : index
      %c0_18 = arith.constant 0 : index
      %20 = vector.load %arg5[%c0_17, %c0_18] : memref<1x64xf32, #tpu.memory_space<vmem>>, vector<1x64xf32>
      %21 = vector.broadcast %20 : vector<1x64xf32> to vector<4x64xf32>
      %22 = arith.addf %19, %21 : vector<4x64xf32>
      %cst_19 = arith.constant 0.000000e+00 : f32
      %23 = vector.broadcast %cst_19 : f32 to vector<4x64xf32>
      %24 = arith.maximumf %22, %23 : vector<4x64xf32>
      %c0_20 = arith.constant 0 : index
      %c0_21 = arith.constant 0 : index
      %25 = vector.load %arg6[%c0_20, %c0_21] : memref<64x3xf32, #tpu.memory_space<vmem>>, vector<64x3xf32>
      %cst_22 = arith.constant dense<0.000000e+00> : vector<4x3xf32>
      %26 = tpu.matmul %24, %25, %cst_22 {dimension_numbers = #tpu.dot_dimension_numbers<[1], [0], [0], [1], [0, 0, 1, 1], [], []>} : vector<4x64xf32>, vector<64x3xf32>, vector<4x3xf32> -> vector<4x3xf32>
      %c0_23 = arith.constant 0 : index
      %c0_24 = arith.constant 0 : index
      %27 = vector.load %arg7[%c0_23, %c0_24] : memref<1x3xf32, #tpu.memory_space<vmem>>, vector<1x3xf32>
      %28 = vector.broadcast %27 : vector<1x3xf32> to vector<4x3xf32>
      %29 = arith.addf %26, %28 : vector<4x3xf32>
      %c0_25 = arith.constant 0 : index
      %c0_26 = arith.constant 0 : index
      %30 = vector.load %arg8[%c0_25, %c0_26] : memref<4x3xf32, #tpu.memory_space<vmem>>, vector<4x3xf32>
      tpu.vector_store %arg8[%c0_25, %c0_26], %29 {strides = array<i32>} : memref<4x3xf32, #tpu.memory_space<vmem>>, vector<4x3xf32>,
    } else {
    }
    return
  }
  func.func @transform_0(%arg0: i32) -> (i32, i32) {
    %c0_i32 = arith.constant 0 : i32
    %c0_i32_0 = arith.constant 0 : i32
    return %c0_i32, %arg0 : i32, i32
  }
  func.func @transform_1(%arg0: i32) -> (i32, i32) {
    %c0_i32 = arith.constant 0 : i32
    %c0_i32_0 = arith.constant 0 : i32
    return %arg0, %c0_i32 : i32, i32
  }
  func.func @transform_2(%arg0: i32) -> (i32, i32) {
    %c0_i32 = arith.constant 0 : i32
    %c0_i32_0 = arith.constant 0 : i32
    %c0_i32_1 = arith.constant 0 : i32
    return %c0_i32, %c0_i32_0 : i32, i32
  }
  func.func @transform_3(%arg0: i32) -> (i32, i32) {
    %c0_i32 = arith.constant 0 : i32
    %c0_i32_0 = arith.constant 0 : i32
    %c0_i32_1 = arith.constant 0 : i32
    return %c0_i32, %c0_i32_0 : i32, i32
  }
  func.func @transform_4(%arg0: i32) -> (i32, i32) {
    %c0_i32 = arith.constant 0 : i32
    %c0_i32_0 = arith.constant 0 : i32
    %c0_i32_1 = arith.constant 0 : i32
    return %c0_i32, %c0_i32_0 : i32, i32
  }
  func.func @transform_5(%arg0: i32) -> (i32, i32) {
    %c0_i32 = arith.constant 0 : i32
    %c0_i32_0 = arith.constant 0 : i32
    %c0_i32_1 = arith.constant 0 : i32
    return %c0_i32, %c0_i32_0 : i32, i32
  }
  func.func @transform_6(%arg0: i32) -> (i32, i32) {
    %c0_i32 = arith.constant 0 : i32
    %c0_i32_0 = arith.constant 0 : i32
    %c0_i32_1 = arith.constant 0 : i32
    return %c0_i32, %c0_i32_0 : i32, i32
  }
  func.func @transform_7(%arg0: i32) -> (i32, i32) {
    %c0_i32 = arith.constant 0 : i32
    %c0_i32_0 = arith.constant 0 : i32
    %c0_i32_1 = arith.constant 0 : i32
    return %c0_i32, %c0_i32_0 : i32, i32
  }
}

</mosaic_0001>

<bundles_post_ra>
// kernel: tpu_custom_call.1
= control target key start
LH: loop header
LB: loop body
LE: loop exit
PB: predicated region body
PF: predicated region fallthrough
CT: control target
= control target key end

     0   :  { %12 = vsyncpa [#allocation4], 0  ;;  %s3221_s0 = inlined_call_operand.hbm [shape: f32[4,8192], index: 0, kind: input, shape index: {}]   ;;  %s3222_s1 = inlined_call_operand.hbm [shape: f32[8192,128], index: 1, kind: input, shape index: {}]   ;;  %s3223_s2 = inlined_call_operand.hbm [shape: f32[1,128], index: 2, kind: input, shape index: {}]   ;;  %s3224_s3 = inlined_call_operand.vmem [shape: f32[128,64], index: 3, kind: input, shape index: {}]   ;;  %s3225_s4 = inlined_call_operand.hbm [shape: f32[1,64], index: 4, kind: input, shape index: {}]   ;;  %s3226_s5 = inlined_call_operand.vmem [shape: f32[64,3], index: 5, kind: input, shape index: {}]   ;;  %s3227_s6 = inlined_call_operand.hbm [shape: f32[1,3], index: 6, kind: input, shape index: {}]   ;;  %s3228_s7 = inlined_call_operand.hbm [shape: f32[4,3], index: 7, kind: output, shape index: {}]  }
   0x1   :  { %14 = vsyncpa [#allocation4 + $0x1], 0 }
   0x2   :  { %15 = vsyncpa [#allocation7], 0 }
   0x3   :  { %17 = vsyncpa [#allocation7 + $0x1], 0 }
   0x4   :  { %18 = vsyncpa [#allocation10], 0 }
   0x5   :  { %19 = vsyncpa [#allocation5], 0  ;;  %s2577_s24 = smov 0   ;;  %s2579_s25 = smov 0  }
   0x6   :  { %s2581_s26 = smov 0   ;;  %s2583_s27 = smov 0  }
   0x7 LB: > { %s2596_s28 = sadd.s32 4294967295, %s2523_s27   ;;  %p45_p0 = scmp.ne.s32.totalorder %s2515_s25, %s2511_s24  ;;  %s2523_s27 = sphi %s2583_s27, %s3247_s27   ;;  %s2519_s26 = sphi %s2581_s26, %s3246_s26   ;;  %s2515_s25 = sphi %s2579_s25, %s3245_s25   ;;  %s2511_s24 = sphi %s2577_s24, %s3244_s24  }
   0x8   : > { %p3229_p1 = scmp.eq.s32.totalorder %s2596_s28, 0  ;;  %p1526_p2 = scmp.ge.s32.totalorder %s2523_s27, 1 }
   0x9   : > { %p208_p3 = scmp.lt.s32.totalorder %s2523_s27, 5  ;;  %s2525_s8 = smov [#allocation8]  }
   0xa   : > { %p2605_p5 = por %p3229_p1, %p45_p0  ;;  %s221_s9 = sshll.u32 %s2525_s8, 4  ;;  %s222_s9 = int_to_ptr.vmem [resolvable:$true] %s221_s9 }
   0xb   : > { %p2609_p6 = pnand %p1526_p2, %p208_p3  ;;  %s2526_s10 = smov [#allocation9]  }
   0xc   : > { %s3232_s29 = scalar_select %p2605_p5, 1, 0 }
   0xd   : > { %s3233_s30 = scalar_select %p2609_p6, 1, 0 }
   0xe   : > { %p2227_p7 = pneg %p2609_p6  ;;  %s235_s11 = sshll.u32 %s2526_s10, 4  ;;  %s2621_s11 = int_to_ptr.vmem [resolvable:$true] %s235_s11 }
   0xf   : > { %s2527_s13 = smov [#allocation11]   ;;  %s2303_s17 = scalar_lea.hbm %s3223_s2, 16 }
  0x10   : > { %p2617_p8 = pnand %p2227_p7, %p3229_p1  ;;  %s249_s14 = sshll.u32 %s2527_s13, 4  ;;  %s2623_s14 = int_to_ptr.vmem [resolvable:$true] %s249_s14 }
  0x11   : > { %p2304_p9 = scmp.ne.s32.totalorder %s3223_s2, %s2303_s17  ;;  %p2310_p13 = scmp.lt.u32.totalorder %s2303_s17, %s3223_s2 }
  0x12   : > { %p2633_p10 = pneg %p2617_p8 }
  0x14   : > { %p2306_p11 = pnand %p2633_p10, %p2304_p9 }
  0x16   : > { %p2307_p12 = pneg %p2306_p11 }
  0x18   : > { %p2312_p0 = pnand %p2310_p13, %p2307_p12 }
  0x1a   : > { %2315 = shalt.err (!%p2312_p0)
}
  0x1b   : > { %s2316_s23 = scalar_lea.vmem %s222_s9, 16  ;;  %s2323_s24 = scalar_lea.vmem %s222_s9, 32 }
  0x1c   : > { %p2317_p2 = scmp.ne.s32.totalorder %s222_s9, %s2316_s23  ;;  %p2324_p4 = scmp.lt.s32.totalorder %s222_s9, %s222_s9 }
  0x1d   : > { %p2325_p1 = scmp.lt.s32.totalorder %s2323_s24, %s2316_s23 }
  0x1e   : > { %p2319_p3 = pnand %p2317_p2, %p2633_p10 }
  0x1f   : > { %p2326_p5 = por %p2325_p1, %p2324_p4 }
  0x20   : > { %p2320_p7 = pneg %p2319_p3 }
  0x22   : > { %p2327_p6 = pnand %p2326_p5, %p2320_p7 }
  0x24   : > { %2330 = shalt.err (!%p2327_p6)
}
  0x25   : > { %2230 = dma.hbm_to_vmem [thread:$0]  (!%p2617_p8), %s3223_s2, 16, %s222_s9, [#allocation7]  }
  0x26   : > { %s2331_s16 = scalar_lea.hbm %s3225_s4, 16 }
  0x27   : > { %p2332_p9 = scmp.ne.s32.totalorder %s3225_s4, %s2331_s16  ;;  %p2338_p4 = scmp.lt.u32.totalorder %s2331_s16, %s3225_s4 }
  0x29   : > { %p2334_p11 = pnand %p2332_p9, %p2633_p10 }
  0x2b   : > { %p2335_p1 = pneg %p2334_p11 }
  0x2d   : > { %p2340_p5 = pnand %p2338_p4, %p2335_p1 }
  0x2f   : > { %2343 = shalt.err (!%p2340_p5)
}
  0x30   : > { %s2344_s9 = scalar_lea.vmem %s2621_s11, 16  ;;  %s2351_s22 = scalar_lea.vmem %s2621_s11, 32 }
  0x31   : > { %p2345_p6 = scmp.ne.s32.totalorder %s2621_s11, %s2344_s9  ;;  %p2352_p0 = scmp.lt.s32.totalorder %s2621_s11, %s2621_s11 }
  0x32   : > { %p2353_p2 = scmp.lt.s32.totalorder %s2351_s22, %s2344_s9 }
  0x33   : > { %p2347_p12 = pnand %p2345_p6, %p2633_p10 }
  0x34   : > { %p2354_p3 = por %p2353_p2, %p2352_p0 }
  0x35   : > { %p2348_p13 = pneg %p2347_p12 }
  0x37   : > { %p2355_p7 = pnand %p2354_p3, %p2348_p13 }
  0x39   : > { %2358 = shalt.err (!%p2355_p7)
}
  0x3a   : > { %2233 = dma.hbm_to_vmem [thread:$0]  (!%p2617_p8), %s3225_s4, 16, %s2621_s11, [#allocation10]  }
  0x3b   : > { %s2359_s13 = scalar_lea.hbm %s3227_s6, 16 }
  0x3c   : > { %p2360_p9 = scmp.ne.s32.totalorder %s3227_s6, %s2359_s13  ;;  %p2366_p4 = scmp.lt.u32.totalorder %s2359_s13, %s3227_s6 }
  0x3e   : > { %p2362_p11 = pnand %p2360_p9, %p2633_p10 }
  0x40   : > { %p2363_p1 = pneg %p2362_p11 }
  0x42   : > { %p2368_p5 = pnand %p2366_p4, %p2363_p1 }
  0x44   : > { %2371 = shalt.err (!%p2368_p5)
}
  0x45   : > { %s2372_s11 = scalar_lea.vmem %s2623_s14, 16  ;;  %s2379_s19 = scalar_lea.vmem %s2623_s14, 32 }
  0x46   : > { %p2373_p6 = scmp.ne.s32.totalorder %s2623_s14, %s2372_s11  ;;  %p2380_p0 = scmp.lt.s32.totalorder %s2623_s14, %s2623_s14 }
  0x47   : > { %p2381_p2 = scmp.lt.s32.totalorder %s2379_s19, %s2372_s11 }
  0x48   : > { %p2375_p12 = pnand %p2373_p6, %p2633_p10 }
  0x49   : > { %p2382_p3 = por %p2381_p2, %p2380_p0 }
  0x4a   : > { %p2376_p13 = pneg %p2375_p12 }
  0x4c   : > { %p2383_p7 = pnand %p2382_p3, %p2376_p13 }
  0x4e   : > { %2386 = shalt.err (!%p2383_p7)
}
  0x4f   : > { %2236 = dma.hbm_to_vmem [thread:$0]  (!%p2617_p8), %s3227_s6, 16, %s2623_s14, [#allocation10]  }
  0x50   : > { %s2698_s20 = sadd.s32 1, %s2523_s27   ;;  %s32_s12 = sadd.s32 1, %s2519_s26 }
  0x51   : > { %s29_s22 = ssub.s32 %s2523_s27, %s2698_s20  ;;  %p39_p9 = scmp.ne.s32.totalorder %s2519_s26, %s2515_s25 }
  0x52   : > { %p30_p10 = scmp.eq.s32.totalorder %s29_s22, 0  ;;  %p40_p11 = scmp.eq.s32.totalorder %s2523_s27, 0 }
  0x53   : > { %p2247_p1 = scmp.lt.s32.totalorder %s2523_s27, 4  ;;  %s2711_s24 = sand.u32 1, %s2519_s26  }
  0x54   : > { %s2708_s23 = scalar_select %p30_p10, %s2519_s26, %s32_s12  }
  0x55   : > { %p41_p4 = por %p40_p11, %p39_p9  ;;  %s1531_s8 = sshll.u32 %s2711_s24, 6 }
  0x56   : > { %s1553_s14 = sshll.u32 %s2523_s27, 10  ;;  %s264_s16 = scalar_lea.vmem [#allocation3], %s1531_s8 }
  0x57   : > { %s2718_s15 = scalar_lea.hbm %s3221_s0, %s1553_s14  ;;  %s272_s17 = sshll.u32 %s264_s16, 4  ;;  %s2720_s17 = int_to_ptr.vmem [resolvable:$true] %s272_s17 }
  0x58   : > { %p2722_p8 = pnand %p2247_p1, %p41_p4  ;;  %s1534_s11 = sshll.u32 %s2711_s24, 11 }
  0x59   : > { %s279_s19 = sand.u32 1, %s2523_s27   ;;  %s261_s21 = scalar_lea.sflag [#allocation4], %s2711_s24 }
  0x5a   : > { %s2387_s9 = scalar_lea.hbm %s2718_s15, 1024  ;;  %p2389_p6 = pneg %p2722_p8 }
  0x5b   : > { %p2388_p5 = scmp.ne.s32.totalorder %s2718_s15, %s2387_s9  ;;  %s2392_s8 = scalar_lea.hbm %s3221_s0, 4096 }
  0x5c   : > { %p2393_p0 = scmp.lt.u32.totalorder %s2718_s15, %s3221_s0  ;;  %p2394_p2 = scmp.lt.u32.totalorder %s2392_s8, %s2387_s9 }
  0x5d   : > { %p2390_p12 = pnand %p2389_p6, %p2388_p5  ;;  %p2396_p7 = scmp.lt.u32.totalorder %s2387_s9, %s2718_s15 }
  0x5e   : > { %p2395_p3 = por %p2394_p2, %p2393_p0 }
  0x5f   : > { %p2391_p13 = pneg %p2390_p12 }
  0x60   : > { %p2397_p10 = por %p2396_p7, %p2395_p3 }
  0x62   : > { %p2398_p9 = pnand %p2397_p10, %p2391_p13 }
  0x64   : > { %2401 = shalt.err (!%p2398_p9)
}
  0x65   : > { %s2402_s13 = scalar_lea.vmem %s2720_s17, 1024  ;;  %s2528_s16 = smov [#allocation3]  }
  0x66   : > { %p2403_p11 = scmp.ne.s32.totalorder %s2720_s17, %s2402_s13  ;;  %s2407_s22 = sshll.u32 %s2528_s16, 4  ;;  %s2408_s22 = int_to_ptr.vmem [resolvable:$false] %s2407_s22 }
  0x67   : > { %s2409_s12 = scalar_lea.vmem %s2408_s22, 2048  ;;  %p2410_p5 = scmp.lt.s32.totalorder %s2720_s17, %s2408_s22 }
  0x68   : > { %p2405_p1 = pnand %p2403_p11, %p2389_p6  ;;  %p2411_p12 = scmp.lt.s32.totalorder %s2409_s12, %s2402_s13 }
  0x6a   : > { %p2406_p4 = pneg %p2405_p1  ;;  %p2412_p0 = por %p2411_p12, %p2410_p5 }
  0x6c   : > { %p2413_p2 = pnand %p2412_p0, %p2406_p4 }
  0x6e   : > { %2416 = shalt.err (!%p2413_p2)
}
  0x6f   : > { %2240 = dma.hbm_to_vmem [thread:$0]  (!%p2722_p8), %s2718_s15, 1024, %s2720_s17, %s261_s21  }
  0x70   : > { %s283_s9 = scalar_lea.vmem [#allocation6], %s1534_s11  ;;  %s1554_s14 = sshll.u32 %s2523_s27, 15 }
  0x71   : > { %s290_s8 = sshll.u32 %s283_s9, 4  ;;  %s2762_s16 = scalar_lea.hbm %s3222_s1, %s1554_s14  ;;  %s2756_s8 = int_to_ptr.vmem [resolvable:$true] %s290_s8 }
  0x72   : > { %s2766_s22 = scalar_lea.sflag [#allocation7], %s279_s19  ;;  %s2417_s12 = scalar_lea.hbm %s2762_s16, 32768 }
  0x73   : > { %p2418_p13 = scmp.ne.s32.totalorder %s2762_s16, %s2417_s12  ;;  %s2422_s17 = scalar_lea.hbm %s3222_s1, 131072 }
  0x74   : > { %p2423_p10 = scmp.lt.u32.totalorder %s2762_s16, %s3222_s1  ;;  %p2424_p9 = scmp.lt.u32.totalorder %s2422_s17, %s2417_s12 }
  0x75   : > { %p2420_p3 = pnand %p2418_p13, %p2389_p6  ;;  %p2426_p1 = scmp.lt.u32.totalorder %s2417_s12, %s2762_s16 }
  0x76   : > { %p2425_p11 = por %p2424_p9, %p2423_p10 }
  0x77   : > { %p2421_p7 = pneg %p2420_p3 }
  0x78   : > { %p2427_p4 = por %p2426_p1, %p2425_p11 }
  0x7a   : > { %p2428_p5 = pnand %p2427_p4, %p2421_p7 }
  0x7c   : > { %2431 = shalt.err (!%p2428_p5)
}
  0x7d   : > { %s2432_s27 = scalar_lea.vmem %s2756_s8, 32768  ;;  %s2529_s19 = smov [#allocation6]  }
  0x7e   : > { %p2433_p12 = scmp.ne.s32.totalorder %s2756_s8, %s2432_s27  ;;  %s2437_s9 = sshll.u32 %s2529_s19, 4  ;;  %s2438_s9 = int_to_ptr.vmem [resolvable:$false] %s2437_s9 }
  0x7f   : > { %s2439_s14 = scalar_lea.vmem %s2438_s9, 65536  ;;  %p2440_p13 = scmp.lt.s32.totalorder %s2756_s8, %s2438_s9 }
  0x80   : > { %p2435_p0 = pnand %p2433_p12, %p2389_p6  ;;  %p2441_p3 = scmp.lt.s32.totalorder %s2439_s14, %s2432_s27 }
  0x82   : > { %p2436_p2 = pneg %p2435_p0  ;;  %p2442_p10 = por %p2441_p3, %p2440_p13 }
  0x84   : > { %p2443_p9 = pnand %p2442_p10, %p2436_p2 }
  0x86   : > { %2446 = shalt.err (!%p2443_p9)
}
  0x87   : > { %s2530_s10 = smov 128   ;;  %s2531_s13 = smov 8  }
  0x88   : > { %2243 = dma.hbm_to_vmem [thread:$0]  (!%p2722_p8), %s2762_s16, 32768, %s2756_s8, %s2766_s22, %s2530_s10, %s2530_s10, %s2531_s13  }
  0x89   : > { %p3237_p6 = scmp.ne.s32.totalorder %s3233_s30, 0 }
  0x8a   : > { %s304_s12 = sand.u32 (!%p3237_p6), 1, %s2515_s25   ;;  %p3238_p7 = scmp.ne.s32.totalorder (!%p3237_p6), %s3232_s29, 0 }
  0x8b   : > { %302 = sbr.rel (%p3237_p6) target bundleno = 986 (0x3da), region = 48  ;;  %s1538_s24 = sshll.u32 (!%p3237_p6), %s304_s12, 6 }
  0x8c   : > { %s305_s15 = scalar_lea.sflag (!%p3237_p6), [#allocation4], %s304_s12  ;;  %s2795_s17 = scalar_lea.vmem (!%p3237_p6), [#allocation3], %s1538_s24 }
  0x92   : > { %2490 = dma.done.wait (%p3238_p7), %s305_s15, 1024  }
  0x93   : > { %2492 = vsyncadd (%p3238_p7), %s305_s15, 4294966272  ;;  %s313_s11 = sand.u32 1, %s2596_s28   ;;  %s1539_s18 = sshll.u32 %s304_s12, 11 }
  0x94   : > { %s314_s8 = scalar_lea.sflag [#allocation7], %s313_s11  ;;  %s2802_s16 = scalar_lea.vmem [#allocation6], %s1539_s18 }
  0x95   : > { %2494 = dma.done.wait (%p3238_p7), %s314_s8, 32768  }
  0x96   : > { %2496 = vsyncadd (%p3238_p7), %s314_s8, 4294934528  ;;  %p3239_p8 = scmp.eq.s32.totalorder %s2596_s28, 0 }
  0x98   : > { %2498 = dma.done.wait (%p3239_p8), [#allocation7], 16   ;;  %p3240_p11 = pmov %p3239_p8 }
  0x99   : > { %p3241_p1 = pmov %p3239_p8 }
  0x9a   : > { %2500 = vsyncadd (%p3240_p11), [#allocation7], 4294967280 }
  0x9b   : > { %2502 = dma.done.wait (%p3241_p1), [#allocation10], 32   ;;  %p3242_p4 = pmov %p3241_p1 }
  0x9c   : > { %p3243_p5 = scmp.ne.s32.totalorder %s2596_s28, 0 }
  0x9d   : > { %2504 = vsyncadd (%p3242_p4), [#allocation10], 4294967264  ;;  %v2532_v0 = vmov (!%p3243_p5), 0.0  }
  0x9e   : > { %365 = sbr.rel (%p3243_p5) target bundleno = 165 (0xa5), region = 72  ;;  %366 = vst [vmem:[#allocation2] sm:$0xf] (!%p3243_p5), %v2532_v0 }
  0xa5 PF: > { %v392_v1 = vld [vmem:[%s2802_s16 + $0x80] sm:$0xff]  ;;  %v393_v2 = vld [vmem:[%s2802_s16 + $0x88] sm:$0xff]  ;;  %v394_v12 = vld [vmem:[%s2802_s16 + $0x90] sm:$0xff]  ;;  %p1544_p12 = scmp.ne.s32.totalorder %s2596_s28, 3 }
  0xa6   : > { %v424_v3 = vld [vmem:[%s2802_s16 + $0x180] sm:$0xff]  ;;  %v1915_v4 = vpack.c.bf16 %v393_v2, %v392_v1  ;;  %v425_v5 = vld [vmem:[%s2802_s16 + $0x188] sm:$0xff]  ;;  %v395_v14 = vld [vmem:[%s2802_s16 + $0x98] sm:$0xff]  ;;  %vm2534_vm0 = vmmov (!%p1544_p12), 0   ;;  %vm1341_vm1 = vcmask (!%p1544_p12), 523264   ;;  %vm1415_vm2 = vcmask (!%p1544_p12), 19456  }
  0xa7   : > { %v376_v6 = vld [vmem:[%s2802_s16] sm:$0xff]  ;;  %v377_v7 = vld [vmem:[%s2802_s16 + $0x8] sm:$0xff]  ;;  %v1947_v8 = vpack.c.bf16 %v425_v5, %v424_v3  ;;  %v426_v15 = vld [vmem:[%s2802_s16 + $0x190] sm:$0xff]  ;;  %v1919_v17 = vpack.c.bf16 %v395_v14, %v394_v12 }
  0xa8   : > { %v1917_v9 = vpack.c.bf16 %v377_v7, %v376_v6  ;;  %v408_v10 = vld [vmem:[%s2802_s16 + $0x100] sm:$0xff]  ;;  %v409_v11 = vld [vmem:[%s2802_s16 + $0x108] sm:$0xff]  ;;  %1916 = vmatprep.subr.bf16.mxu0 %v1915_v4  ;;  %v427_v16 = vld [vmem:[%s2802_s16 + $0x198] sm:$0xff] }
  0xa9   : > { %v1949_v13 = vpack.c.bf16 %v409_v11, %v408_v10  ;;  %1948 = vmatprep.subr.bf16.mxu1 %v1947_v8  ;;  %v1951_v18 = vpack.c.bf16 %v427_v16, %v426_v15  ;;  %v378_v19 = vld [vmem:[%s2802_s16 + $0x10] sm:$0xff]  ;;  %v379_v20 = vld [vmem:[%s2802_s16 + $0x18] sm:$0xff]  ;;  %v396_v24 = vld [vmem:[%s2802_s16 + $0xa0] sm:$0xff] }
  0xaa   : > { %1918 = vmatpush3.bf16.msra.mxu0 %v1917_v9  ;;  %v410_v21 = vld [vmem:[%s2802_s16 + $0x110] sm:$0xff]  ;;  %v1921_v22 = vpack.c.bf16 %v379_v20, %v378_v19  ;;  %v411_v23 = vld [vmem:[%s2802_s16 + $0x118] sm:$0xff]  ;;  %v397_v25 = vld [vmem:[%s2802_s16 + $0xa8] sm:$0xff] }
  0xab   : > { %1950 = vmatpush3.bf16.msra.mxu1 %v1949_v13  ;;  %1920 = vmatprep.subr.bf16.mxu0 %v1919_v17  ;;  %v1953_v26 = vpack.c.bf16 %v411_v23, %v410_v21  ;;  %v1923_v27 = vpack.c.bf16 %v397_v25, %v396_v24  ;;  %v428_v28 = vld [vmem:[%s2802_s16 + $0x1a0] sm:$0xff]  ;;  %v429_v29 = vld [vmem:[%s2802_s16 + $0x1a8] sm:$0xff]  ;;  %v398_v36 = vld [vmem:[%s2802_s16 + $0xb0] sm:$0xff] }
  0xac   : > { %1952 = vmatprep.subr.bf16.mxu1 %v1951_v18  ;;  %v380_v30 = vld [vmem:[%s2802_s16 + $0x20] sm:$0xff]  ;;  %v1955_v31 = vpack.c.bf16 %v429_v29, %v428_v28  ;;  %v381_v32 = vld [vmem:[%s2802_s16 + $0x28] sm:$0xff]  ;;  %v399_v37 = vld [vmem:[%s2802_s16 + $0xb8] sm:$0xff] }
  0xad   : > { %v412_v33 = vld [vmem:[%s2802_s16 + $0x120] sm:$0xff]  ;;  %v413_v34 = vld [vmem:[%s2802_s16 + $0x128] sm:$0xff]  ;;  %v1925_v35 = vpack.c.bf16 %v381_v32, %v380_v30  ;;  %v430_v38 = vld [vmem:[%s2802_s16 + $0x1b0] sm:$0xff]  ;;  %v1927_v40 = vpack.c.bf16 %v399_v37, %v398_v36 }
  0xae   : > { %1922 = vmatpush3.bf16.msra.mxu0 %v1921_v22  ;;  %v1957_v39 = vpack.c.bf16 %v413_v34, %v412_v33  ;;  %v431_v41 = vld [vmem:[%s2802_s16 + $0x1b8] sm:$0xff]  ;;  %v382_v42 = vld [vmem:[%s2802_s16 + $0x30] sm:$0xff]  ;;  %v400_v47 = vld [vmem:[%s2802_s16 + $0xc0] sm:$0xff] }
  0xaf   : > { %1954 = vmatpush3.bf16.msra.mxu1 %v1953_v26  ;;  %1924 = vmatprep.subr.bf16.mxu0 %v1923_v27  ;;  %v383_v43 = vld [vmem:[%s2802_s16 + $0x38] sm:$0xff]  ;;  %v1959_v44 = vpack.c.bf16 %v431_v41, %v430_v38  ;;  %v414_v45 = vld [vmem:[%s2802_s16 + $0x130] sm:$0xff]  ;;  %v401_v48 = vld [vmem:[%s2802_s16 + $0xc8] sm:$0xff] }
  0xb0   : > { %1956 = vmatprep.subr.bf16.mxu1 %v1955_v31  ;;  %v415_v46 = vld [vmem:[%s2802_s16 + $0x138] sm:$0xff]  ;;  %v432_v49 = vld [vmem:[%s2802_s16 + $0x1c0] sm:$0xff]  ;;  %v433_v50 = vld [vmem:[%s2802_s16 + $0x1c8] sm:$0xff]  ;;  %v1929_v51 = vpack.c.bf16 %v383_v43, %v382_v42  ;;  %v1931_v53 = vpack.c.bf16 %v401_v48, %v400_v47 }
  0xb1   : > { %v1961_v52 = vpack.c.bf16 %v415_v46, %v414_v45  ;;  %v384_v54 = vld [vmem:[%s2802_s16 + $0x40] sm:$0xff]  ;;  %v385_v55 = vld [vmem:[%s2802_s16 + $0x48] sm:$0xff]  ;;  %v1963_v57 = vpack.c.bf16 %v433_v50, %v432_v49  ;;  %v402_v59 = vld [vmem:[%s2802_s16 + $0xd0] sm:$0xff] }
  0xb2   : > { %1926 = vmatpush3.bf16.msra.mxu0 %v1925_v35  ;;  %v416_v56 = vld [vmem:[%s2802_s16 + $0x140] sm:$0xff]  ;;  %v417_v58 = vld [vmem:[%s2802_s16 + $0x148] sm:$0xff]  ;;  %v403_v60 = vld [vmem:[%s2802_s16 + $0xd8] sm:$0xff]  ;;  %v1933_v63 = vpack.c.bf16 %v385_v55, %v384_v54 }
  0xb3   : > { %1958 = vmatpush3.bf16.msra.mxu1 %v1957_v39  ;;  %1928 = vmatprep.subr.bf16.mxu0 %v1927_v40  ;;  %v434_v61 = vld [vmem:[%s2802_s16 + $0x1d0] sm:$0xff]  ;;  %v435_v62 = vld [vmem:[%s2802_s16 + $0x1d8] sm:$0xff]  ;;  %v1965_v0 = vpack.c.bf16 %v417_v58, %v416_v56  ;;  %v1935_v1 = vpack.c.bf16 %v403_v60, %v402_v59  ;;  %v404_v7 = vld [vmem:[%s2802_s16 + $0xe0] sm:$0xff] }
  0xb4   : > { %1960 = vmatprep.subr.bf16.mxu1 %v1959_v44  ;;  %v386_v2 = vld [vmem:[%s2802_s16 + $0x50] sm:$0xff]  ;;  %v387_v3 = vld [vmem:[%s2802_s16 + $0x58] sm:$0xff]  ;;  %v1967_v5 = vpack.c.bf16 %v435_v62, %v434_v61  ;;  %v405_v8 = vld [vmem:[%s2802_s16 + $0xe8] sm:$0xff] }
  0xb5   : > { %v418_v4 = vld [vmem:[%s2802_s16 + $0x150] sm:$0xff]  ;;  %v419_v6 = vld [vmem:[%s2802_s16 + $0x158] sm:$0xff]  ;;  %v436_v9 = vld [vmem:[%s2802_s16 + $0x1e0] sm:$0xff]  ;;  %v1937_v11 = vpack.c.bf16 %v387_v3, %v386_v2  ;;  %v1939_v15 = vpack.c.bf16 %v405_v8, %v404_v7 }
  0xb6   : > { %1930 = vmatpush3.bf16.msra.mxu0 %v1929_v51  ;;  %v437_v10 = vld [vmem:[%s2802_s16 + $0x1e8] sm:$0xff]  ;;  %v388_v12 = vld [vmem:[%s2802_s16 + $0x60] sm:$0xff]  ;;  %v1969_v14 = vpack.c.bf16 %v419_v6, %v418_v4  ;;  %v406_v21 = vld [vmem:[%s2802_s16 + $0xf0] sm:$0xff] }
  0xb7   : > { %1962 = vmatpush3.bf16.msra.mxu1 %v1961_v52  ;;  %1932 = vmatprep.subr.bf16.mxu0 %v1931_v53  ;;  %v389_v13 = vld [vmem:[%s2802_s16 + $0x68] sm:$0xff]  ;;  %v420_v16 = vld [vmem:[%s2802_s16 + $0x160] sm:$0xff]  ;;  %v1971_v19 = vpack.c.bf16 %v437_v10, %v436_v9  ;;  %v407_v22 = vld [vmem:[%s2802_s16 + $0xf8] sm:$0xff] }
  0xb8   : > { %1964 = vmatprep.subr.bf16.mxu1 %v1963_v57  ;;  %v368_v17 = vld [vmem:[%s2795_s17] sm:$0xff]  ;;  %v369_v18 = vld [vmem:[%s2795_s17 + $0x8] sm:$0xff]  ;;  %v438_v25 = vld [vmem:[%s2802_s16 + $0x1f0] sm:$0xff]  ;;  %v1941_v27 = vpack.c.bf16 %v389_v13, %v388_v12  ;;  %v1943_v29 = vpack.c.bf16 %v407_v22, %v406_v21 }
  0xb9   : > { %v421_v20 = vld [vmem:[%s2802_s16 + $0x168] sm:$0xff]  ;;  %v640_v23 = vcombine.high %v368_v17, %v368_v17  ;;  %v641_v24 = vcombine.high %v369_v18, %v369_v18  ;;  %v439_v26 = vld [vmem:[%s2802_s16 + $0x1f8] sm:$0xff]  ;;  %v390_v30 = vld [vmem:[%s2802_s16 + $0x70] sm:$0xff] }
  0xba   : > { %1934 = vmatpush3.bf16.msra.mxu0 %v1933_v63  ;;  %v1973_v28 = vpack.c.bf16 %v421_v20, %v420_v16  ;;  %v391_v31 = vld [vmem:[%s2802_s16 + $0x78] sm:$0xff]  ;;  %v422_v32 = vld [vmem:[%s2802_s16 + $0x170] sm:$0xff]  ;;  %v1975_v33 = vpack.c.bf16 %v439_v26, %v438_v25  ;;  %v456_v35 = vld [vmem:[%s2802_s16 + $0x280] sm:$0xff] }
  0xbb   : > { %1966 = vmatpush3.bf16.msra.mxu1 %v1965_v0  ;;  %1936 = vmatprep.subr.bf16.mxu0 %v1935_v1  ;;  %v423_v34 = vld [vmem:[%s2802_s16 + $0x178] sm:$0xff]  ;;  %v457_v36 = vld [vmem:[%s2802_s16 + $0x288] sm:$0xff]  ;;  %v488_v37 = vld [vmem:[%s2802_s16 + $0x380] sm:$0xff]  ;;  %v1945_v39 = vpack.c.bf16 %v391_v31, %v390_v30 }
  0xbc   : > { %1968 = vmatprep.subr.bf16.mxu1 %v1967_v5  ;;  %720 = vmatprep.mubr.f32.mxu0 %v640_v23  ;;  %v489_v38 = vld [vmem:[%s2802_s16 + $0x388] sm:$0xff]  ;;  %v1977_v40 = vpack.c.bf16 %v423_v34, %v422_v32  ;;  %v1979_v41 = vpack.c.bf16 %v457_v36, %v456_v35  ;;  %v440_v42 = vld [vmem:[%s2802_s16 + $0x200] sm:$0xff]  ;;  %v458_v47 = vld [vmem:[%s2802_s16 + $0x290] sm:$0xff] }
  0xbd   : > { %790 = vmatprep.mubr.f32.mxu1 %v641_v24  ;;  %v441_v43 = vld [vmem:[%s2802_s16 + $0x208] sm:$0xff]  ;;  %v472_v44 = vld [vmem:[%s2802_s16 + $0x300] sm:$0xff]  ;;  %v2011_v45 = vpack.c.bf16 %v489_v38, %v488_v37  ;;  %v459_v48 = vld [vmem:[%s2802_s16 + $0x298] sm:$0xff] }
  0xbe   : > { %1938 = vmatpush3.bf16.msra.mxu0 %v1937_v11  ;;  %v473_v46 = vld [vmem:[%s2802_s16 + $0x308] sm:$0xff]  ;;  %v490_v49 = vld [vmem:[%s2802_s16 + $0x390] sm:$0xff]  ;;  %v491_v50 = vld [vmem:[%s2802_s16 + $0x398] sm:$0xff]  ;;  %v1981_v51 = vpack.c.bf16 %v441_v43, %v440_v42  ;;  %v1983_v53 = vpack.c.bf16 %v459_v48, %v458_v47 }
  0xbf   : > { %1970 = vmatpush3.bf16.msra.mxu1 %v1969_v14  ;;  %1940 = vmatprep.subr.bf16.mxu0 %v1939_v15  ;;  %v2013_v52 = vpack.c.bf16 %v473_v46, %v472_v44  ;;  %v442_v54 = vld [vmem:[%s2802_s16 + $0x210] sm:$0xff]  ;;  %v443_v55 = vld [vmem:[%s2802_s16 + $0x218] sm:$0xff]  ;;  %v2015_v57 = vpack.c.bf16 %v491_v50, %v490_v49  ;;  %v460_v59 = vld [vmem:[%s2802_s16 + $0x2a0] sm:$0xff] }
  0xc0   : > { %1972 = vmatprep.subr.bf16.mxu1 %v1971_v19  ;;  %v474_v56 = vld [vmem:[%s2802_s16 + $0x310] sm:$0xff]  ;;  %v475_v58 = vld [vmem:[%s2802_s16 + $0x318] sm:$0xff]  ;;  %v461_v60 = vld [vmem:[%s2802_s16 + $0x2a8] sm:$0xff]  ;;  %v1985_v63 = vpack.c.bf16 %v443_v55, %v442_v54 }
  0xc1   : > { %v492_v61 = vld [vmem:[%s2802_s16 + $0x3a0] sm:$0xff]  ;;  %v493_v62 = vld [vmem:[%s2802_s16 + $0x3a8] sm:$0xff]  ;;  %v2017_v0 = vpack.c.bf16 %v475_v58, %v474_v56  ;;  %v1987_v1 = vpack.c.bf16 %v461_v60, %v460_v59  ;;  %v462_v7 = vld [vmem:[%s2802_s16 + $0x2b0] sm:$0xff] }
  0xc2   : > { %1942 = vmatpush3.bf16.msra.mxu0 %v1941_v27  ;;  %v444_v2 = vld [vmem:[%s2802_s16 + $0x220] sm:$0xff]  ;;  %v445_v3 = vld [vmem:[%s2802_s16 + $0x228] sm:$0xff]  ;;  %v2019_v5 = vpack.c.bf16 %v493_v62, %v492_v61  ;;  %v463_v8 = vld [vmem:[%s2802_s16 + $0x2b8] sm:$0xff] }
  0xc3   : > { %1974 = vmatpush3.bf16.msra.mxu1 %v1973_v28  ;;  %1944 = vmatprep.subr.bf16.mxu0 %v1943_v29  ;;  %v476_v4 = vld [vmem:[%s2802_s16 + $0x320] sm:$0xff]  ;;  %v477_v6 = vld [vmem:[%s2802_s16 + $0x328] sm:$0xff]  ;;  %v494_v9 = vld [vmem:[%s2802_s16 + $0x3b0] sm:$0xff]  ;;  %v1989_v11 = vpack.c.bf16 %v445_v3, %v444_v2  ;;  %v1991_v13 = vpack.c.bf16 %v463_v8, %v462_v7 }
  0xc4   : > { %1976 = vmatprep.subr.bf16.mxu1 %v1975_v33  ;;  %v495_v10 = vld [vmem:[%s2802_s16 + $0x3b8] sm:$0xff]  ;;  %v2021_v12 = vpack.c.bf16 %v477_v6, %v476_v4  ;;  %v446_v14 = vld [vmem:[%s2802_s16 + $0x230] sm:$0xff]  ;;  %v464_v19 = vld [vmem:[%s2802_s16 + $0x2c0] sm:$0xff] }
  0xc5   : > { %v447_v15 = vld [vmem:[%s2802_s16 + $0x238] sm:$0xff]  ;;  %v478_v16 = vld [vmem:[%s2802_s16 + $0x330] sm:$0xff]  ;;  %v465_v20 = vld [vmem:[%s2802_s16 + $0x2c8] sm:$0xff] }
  0xc6   : > { %1946 = vmatpush3.bf16.msra.mxu0 %v1945_v39  ;;  %v496_v21 = vld [vmem:[%s2802_s16 + $0x3c0] sm:$0xff]  ;;  %v497_v22 = vld [vmem:[%s2802_s16 + $0x3c8] sm:$0xff]  ;;  %v2921_v23 = vld [vmem:[%s2795_s17 + $0x10] sm:$0xff]  ;;  %v1993_v24 = vpack.c.bf16 %v447_v15, %v446_v14  ;;  %v1995_v28 = vpack.c.bf16 %v465_v20, %v464_v19 }
  0xc7   : > { %1978 = vmatpush3.bf16.msra.mxu1 %v1977_v40  ;;  %1980 = vmatprep.subr.bf16.mxu0 %v1979_v41  ;;  %v642_v25 = vcombine.high %v2921_v23, %v2921_v23  ;;  %v2926_v26 = vld [vmem:[%s2795_s17 + $0x18] sm:$0xff]  ;;  %v448_v29 = vld [vmem:[%s2802_s16 + $0x240] sm:$0xff]  ;;  %v449_v30 = vld [vmem:[%s2802_s16 + $0x248] sm:$0xff]  ;;  %v2027_v33 = vpack.c.bf16 %v497_v22, %v496_v21 }
  0xc8   : > { %2012 = vmatprep.subr.bf16.mxu1 %v2011_v45  ;;  %v480_v31 = vld [vmem:[%s2802_s16 + $0x340] sm:$0xff]  ;;  %v643_v32 = vcombine.high %v2926_v26, %v2926_v26  ;;  %v481_v34 = vld [vmem:[%s2802_s16 + $0x348] sm:$0xff]  ;;  %v466_v35 = vld [vmem:[%s2802_s16 + $0x2d0] sm:$0xff]  ;;  %v1997_v39 = vpack.c.bf16 %v449_v30, %v448_v29 }
  0xc9   : > { %721 = vmatmul.mubr.f32.vlgmr.msra.gmra.mrb[0].mxu0 %v368_v17  ;;  %v2023_v17 = vpack.c.bf16 %v495_v10, %v494_v9  ;;  %v467_v36 = vld [vmem:[%s2802_s16 + $0x2d8] sm:$0xff]  ;;  %v498_v37 = vld [vmem:[%s2802_s16 + $0x3d0] sm:$0xff]  ;;  %v2029_v40 = vpack.c.bf16 %v481_v34, %v480_v31  ;;  %v468_v47 = vld [vmem:[%s2802_s16 + $0x2e0] sm:$0xff] }
  0xca   : > { %791 = vmatmul.mubr.f32.vlgmr.msra.gmra.mrb[0].mxu1 %v369_v18  ;;  %1982 = vmatpush3.bf16.msra.mxu0 %v1981_v51  ;;  %v479_v18 = vld [vmem:[%s2802_s16 + $0x338] sm:$0xff]  ;;  %v1999_v41 = vpack.c.bf16 %v467_v36, %v466_v35  ;;  %v450_v42 = vld [vmem:[%s2802_s16 + $0x250] sm:$0xff]  ;;  %v469_v48 = vld [vmem:[%s2802_s16 + $0x2e8] sm:$0xff] }
  0xcb   : > { %2014 = vmatpush3.bf16.msra.mxu1 %v2013_v52  ;;  %1984 = vmatprep.subr.bf16.mxu0 %v1983_v53  ;;  %v2025_v27 = vpack.c.bf16 %v479_v18, %v478_v16  ;;  %v499_v38 = vld [vmem:[%s2802_s16 + $0x3d8] sm:$0xff]  ;;  %v482_v44 = vld [vmem:[%s2802_s16 + $0x350] sm:$0xff]  ;;  %v500_v49 = vld [vmem:[%s2802_s16 + $0x3e0] sm:$0xff]  ;;  %v2003_v53 = vpack.c.bf16 %v469_v48, %v468_v47 }
  0xcc   : > { %2016 = vmatprep.subr.bf16.mxu1 %v2015_v57  ;;  %860 = vmatprep.mubr.f32.mxu0 %v642_v25  ;;  %v451_v43 = vld [vmem:[%s2802_s16 + $0x258] sm:$0xff]  ;;  %v2031_v45 = vpack.c.bf16 %v499_v38, %v498_v37  ;;  %v501_v50 = vld [vmem:[%s2802_s16 + $0x3e8] sm:$0xff]  ;;  %v452_v54 = vld [vmem:[%s2802_s16 + $0x260] sm:$0xff] }
  0xcd   : > { %930 = vmatprep.mubr.f32.mxu1 %v643_v32  ;;  %v483_v46 = vld [vmem:[%s2802_s16 + $0x358] sm:$0xff]  ;;  %v2001_v51 = vpack.c.bf16 %v451_v43, %v450_v42  ;;  %v453_v55 = vld [vmem:[%s2802_s16 + $0x268] sm:$0xff]  ;;  %v484_v56 = vld [vmem:[%s2802_s16 + $0x360] sm:$0xff]  ;;  %v2035_v57 = vpack.c.bf16 %v501_v50, %v500_v49 }
  0xce   : > { %1986 = vmatpush3.bf16.msra.mxu0 %v1985_v63  ;;  %v2033_v52 = vpack.c.bf16 %v483_v46, %v482_v44  ;;  %v485_v58 = vld [vmem:[%s2802_s16 + $0x368] sm:$0xff]  ;;  %v470_v59 = vld [vmem:[%s2802_s16 + $0x2f0] sm:$0xff]  ;;  %v471_v60 = vld [vmem:[%s2802_s16 + $0x2f8] sm:$0xff]  ;;  %v2005_v63 = vpack.c.bf16 %v453_v55, %v452_v54 }
  0xcf   : > { %2018 = vmatpush3.bf16.msra.mxu1 %v2017_v0  ;;  %1988 = vmatprep.subr.bf16.mxu0 %v1987_v1  ;;  %v502_v61 = vld [vmem:[%s2802_s16 + $0x3f0] sm:$0xff]  ;;  %v503_v62 = vld [vmem:[%s2802_s16 + $0x3f8] sm:$0xff]  ;;  %v2037_v0 = vpack.c.bf16 %v485_v58, %v484_v56  ;;  %v2007_v1 = vpack.c.bf16 %v471_v60, %v470_v59  ;;  %v520_v7 = vld [vmem:[%s2802_s16 + $0x480] sm:$0xff] }
  0xd0   : > { %2020 = vmatprep.subr.bf16.mxu1 %v2019_v5  ;;  %v454_v2 = vld [vmem:[%s2802_s16 + $0x270] sm:$0xff]  ;;  %v455_v3 = vld [vmem:[%s2802_s16 + $0x278] sm:$0xff]  ;;  %v2039_v5 = vpack.c.bf16 %v503_v62, %v502_v61  ;;  %v521_v8 = vld [vmem:[%s2802_s16 + $0x488] sm:$0xff] }
  0xd1   : > { %v486_v4 = vld [vmem:[%s2802_s16 + $0x370] sm:$0xff]  ;;  %v487_v6 = vld [vmem:[%s2802_s16 + $0x378] sm:$0xff]  ;;  %v552_v9 = vld [vmem:[%s2802_s16 + $0x580] sm:$0xff] }
  0xd2   : > { %1990 = vmatpush3.bf16.msra.mxu0 %v1989_v11  ;;  %v553_v10 = vld [vmem:[%s2802_s16 + $0x588] sm:$0xff]  ;;  %v2009_v11 = vpack.c.bf16 %v455_v3, %v454_v2  ;;  %v504_v14 = vld [vmem:[%s2802_s16 + $0x400] sm:$0xff]  ;;  %v522_v19 = vld [vmem:[%s2802_s16 + $0x490] sm:$0xff] }
  0xd3   : > { %2022 = vmatpush3.bf16.msra.mxu1 %v2021_v12  ;;  %1992 = vmatprep.subr.bf16.mxu0 %v1991_v13  ;;  %v2041_v12 = vpack.c.bf16 %v487_v6, %v486_v4  ;;  %v2043_v13 = vpack.c.bf16 %v521_v8, %v520_v7  ;;  %v505_v15 = vld [vmem:[%s2802_s16 + $0x408] sm:$0xff]  ;;  %v536_v16 = vld [vmem:[%s2802_s16 + $0x500] sm:$0xff]  ;;  %v523_v20 = vld [vmem:[%s2802_s16 + $0x498] sm:$0xff] }
  0xd4   : > { %2024 = vmatprep.subr.bf16.mxu1 %v2023_v17  ;;  %v2075_v17 = vpack.c.bf16 %v553_v10, %v552_v9  ;;  %v537_v18 = vld [vmem:[%s2802_s16 + $0x508] sm:$0xff]  ;;  %v554_v21 = vld [vmem:[%s2802_s16 + $0x590] sm:$0xff]  ;;  %v555_v22 = vld [vmem:[%s2802_s16 + $0x598] sm:$0xff]  ;;  %v2047_v29 = vpack.c.bf16 %v523_v20, %v522_v19 }
  0xd5   : > { %v506_v25 = vld [vmem:[%s2802_s16 + $0x410] sm:$0xff]  ;;  %v539_v31 = vld [vmem:[%s2802_s16 + $0x518] sm:$0xff]  ;;  %v2975_v32 = vld [vmem:[%s2795_s17 + $0x20] sm:$0xff] }
  0xd6   : > { %1994 = vmatpush3.bf16.msra.mxu0 %v1993_v24  ;;  %v2045_v24 = vpack.c.bf16 %v505_v15, %v504_v14  ;;  %v538_v30 = vld [vmem:[%s2802_s16 + $0x510] sm:$0xff]  ;;  %v524_v34 = vld [vmem:[%s2802_s16 + $0x4a0] sm:$0xff]  ;;  %v525_v35 = vld [vmem:[%s2802_s16 + $0x4a8] sm:$0xff]  ;;  %v644_v36 = vcombine.high %v2975_v32, %v2975_v32 }
  0xd7   : > { %2026 = vmatpush3.bf16.msra.mxu1 %v2025_v27  ;;  %1996 = vmatprep.subr.bf16.mxu0 %v1995_v28  ;;  %v507_v27 = vld [vmem:[%s2802_s16 + $0x418] sm:$0xff]  ;;  %v2077_v28 = vpack.c.bf16 %v537_v18, %v536_v16  ;;  %v2982_v37 = vld [vmem:[%s2795_s17 + $0x28] sm:$0xff]  ;;  %v556_v38 = vld [vmem:[%s2802_s16 + $0x5a0] sm:$0xff]  ;;  %v2081_v42 = vpack.c.bf16 %v539_v31, %v538_v30  ;;  %v2051_v43 = vpack.c.bf16 %v525_v35, %v524_v34 }
  0xd8   : > { %2028 = vmatprep.subr.bf16.mxu1 %v2027_v33  ;;  %v2079_v33 = vpack.c.bf16 %v555_v22, %v554_v21  ;;  %v508_v44 = vld [vmem:[%s2802_s16 + $0x420] sm:$0xff]  ;;  %v541_v47 = vld [vmem:[%s2802_s16 + $0x528] sm:$0xff]  ;;  %v526_v48 = vld [vmem:[%s2802_s16 + $0x4b0] sm:$0xff] }
  0xd9   : > { %v527_v49 = vld [vmem:[%s2802_s16 + $0x4b8] sm:$0xff]  ;;  %v510_v54 = vld [vmem:[%s2802_s16 + $0x430] sm:$0xff]  ;;  %v528_v59 = vld [vmem:[%s2802_s16 + $0x4c0] sm:$0xff] }
  0xda   : > { %1998 = vmatpush3.bf16.msra.mxu0 %v1997_v39  ;;  %v557_v39 = vld [vmem:[%s2802_s16 + $0x5a8] sm:$0xff]  ;;  %v559_v50 = vld [vmem:[%s2802_s16 + $0x5b8] sm:$0xff]  ;;  %v542_v56 = vld [vmem:[%s2802_s16 + $0x530] sm:$0xff] }
  0xdb   : > { %2030 = vmatpush3.bf16.msra.mxu1 %v2029_v40  ;;  %2000 = vmatprep.subr.bf16.mxu0 %v1999_v41  ;;  %v645_v40 = vcombine.high %v2982_v37, %v2982_v37  ;;  %v2049_v41 = vpack.c.bf16 %v507_v27, %v506_v25  ;;  %v2083_v46 = vpack.c.bf16 %v557_v39, %v556_v38  ;;  %v511_v55 = vld [vmem:[%s2802_s16 + $0x438] sm:$0xff]  ;;  %v529_v60 = vld [vmem:[%s2802_s16 + $0x4c8] sm:$0xff]  ;;  %v560_v61 = vld [vmem:[%s2802_s16 + $0x5c0] sm:$0xff] }
  0xdc   : > { %2032 = vmatprep.subr.bf16.mxu1 %v2031_v45  ;;  %v540_v45 = vld [vmem:[%s2802_s16 + $0x520] sm:$0xff]  ;;  %v543_v58 = vld [vmem:[%s2802_s16 + $0x538] sm:$0xff]  ;;  %v561_v62 = vld [vmem:[%s2802_s16 + $0x5c8] sm:$0xff] }
  0xdd   : > { %v512_v2 = vld [vmem:[%s2802_s16 + $0x440] sm:$0xff]  ;;  %v513_v3 = vld [vmem:[%s2802_s16 + $0x448] sm:$0xff]  ;;  %v530_v7 = vld [vmem:[%s2802_s16 + $0x4d0] sm:$0xff] }
  0xde   : > { %2002 = vmatpush3.bf16.msra.mxu0 %v2001_v51  ;;  %v544_v4 = vld [vmem:[%s2802_s16 + $0x540] sm:$0xff]  ;;  %v545_v6 = vld [vmem:[%s2802_s16 + $0x548] sm:$0xff]  ;;  %v531_v8 = vld [vmem:[%s2802_s16 + $0x4d8] sm:$0xff] }
  0xdf   : > { %2034 = vmatpush3.bf16.msra.mxu1 %v2033_v52  ;;  %2004 = vmatprep.subr.bf16.mxu0 %v2003_v53  ;;  %v2085_v52 = vpack.c.bf16 %v541_v47, %v540_v45  ;;  %v2055_v53 = vpack.c.bf16 %v527_v49, %v526_v48  ;;  %v562_v9 = vld [vmem:[%s2802_s16 + $0x5d0] sm:$0xff]  ;;  %v563_v10 = vld [vmem:[%s2802_s16 + $0x5d8] sm:$0xff]  ;;  %v532_v19 = vld [vmem:[%s2802_s16 + $0x4e0] sm:$0xff] }
  0xe0   : > { %2036 = vmatprep.subr.bf16.mxu1 %v2035_v57  ;;  %v514_v14 = vld [vmem:[%s2802_s16 + $0x450] sm:$0xff]  ;;  %v515_v15 = vld [vmem:[%s2802_s16 + $0x458] sm:$0xff]  ;;  %v533_v20 = vld [vmem:[%s2802_s16 + $0x4e8] sm:$0xff] }
  0xe1   : > { %v546_v16 = vld [vmem:[%s2802_s16 + $0x550] sm:$0xff]  ;;  %v547_v18 = vld [vmem:[%s2802_s16 + $0x558] sm:$0xff]  ;;  %v564_v21 = vld [vmem:[%s2802_s16 + $0x5e0] sm:$0xff]  ;;  %v2067_v27 = vpack.c.bf16 %v533_v20, %v532_v19 }
  0xe2   : > { %2006 = vmatpush3.bf16.msra.mxu0 %v2005_v63  ;;  %v2057_v63 = vpack.c.bf16 %v511_v55, %v510_v54  ;;  %v565_v22 = vld [vmem:[%s2802_s16 + $0x5e8] sm:$0xff]  ;;  %v2097_v25 = vpack.c.bf16 %v547_v18, %v546_v16  ;;  %v548_v30 = vld [vmem:[%s2802_s16 + $0x560] sm:$0xff]  ;;  %v534_v34 = vld [vmem:[%s2802_s16 + $0x4f0] sm:$0xff] }
  0xe3   : > { %2038 = vmatpush3.bf16.msra.mxu1 %v2037_v0  ;;  %2008 = vmatprep.subr.bf16.mxu0 %v2007_v1  ;;  %v2089_v0 = vpack.c.bf16 %v543_v58, %v542_v56  ;;  %v2059_v1 = vpack.c.bf16 %v529_v60, %v528_v59  ;;  %v2099_v31 = vpack.c.bf16 %v565_v22, %v564_v21  ;;  %v535_v35 = vld [vmem:[%s2802_s16 + $0x4f8] sm:$0xff]  ;;  %v585_v47 = vld [vmem:[%s2802_s16 + $0x688] sm:$0xff]  ;;  %v616_v48 = vld [vmem:[%s2802_s16 + $0x780] sm:$0xff] }
  0xe4   : > { %2040 = vmatprep.subr.bf16.mxu1 %v2039_v5  ;;  %v2091_v5 = vpack.c.bf16 %v561_v62, %v560_v61  ;;  %v567_v38 = vld [vmem:[%s2802_s16 + $0x5f8] sm:$0xff]  ;;  %v617_v49 = vld [vmem:[%s2802_s16 + $0x788] sm:$0xff]  ;;  %v600_v54 = vld [vmem:[%s2802_s16 + $0x700] sm:$0xff] }
  0xe5   : > { %v551_v45 = vld [vmem:[%s2802_s16 + $0x578] sm:$0xff]  ;;  %v2139_v55 = vpack.c.bf16 %v617_v49, %v616_v48  ;;  %v601_v56 = vld [vmem:[%s2802_s16 + $0x708] sm:$0xff]  ;;  %v618_v59 = vld [vmem:[%s2802_s16 + $0x790] sm:$0xff] }
  0xe6   : > { %2010 = vmatpush3.bf16.msra.mxu0 %v2009_v11  ;;  %v2061_v11 = vpack.c.bf16 %v513_v3, %v512_v2  ;;  %v587_v58 = vld [vmem:[%s2802_s16 + $0x698] sm:$0xff]  ;;  %v3047_v61 = vld [vmem:[%s2795_s17 + $0x30] sm:$0xff]  ;;  %v572_v16 = vld [vmem:[%s2802_s16 + $0x620] sm:$0xff] }
  0xe7   : > { %2042 = vmatpush3.bf16.msra.mxu1 %v2041_v12  ;;  %2044 = vmatprep.subr.bf16.mxu0 %v2043_v13  ;;  %v2093_v12 = vpack.c.bf16 %v545_v6, %v544_v4  ;;  %v2063_v13 = vpack.c.bf16 %v531_v8, %v530_v7  ;;  %v619_v60 = vld [vmem:[%s2802_s16 + $0x798] sm:$0xff]  ;;  %v570_v2 = vld [vmem:[%s2802_s16 + $0x610] sm:$0xff]  ;;  %v588_v7 = vld [vmem:[%s2802_s16 + $0x6a0] sm:$0xff] }
  0xe8   : > { %2076 = vmatprep.subr.bf16.mxu1 %v2075_v17  ;;  %v2095_v17 = vpack.c.bf16 %v563_v10, %v562_v9  ;;  %v571_v3 = vld [vmem:[%s2802_s16 + $0x618] sm:$0xff]  ;;  %v602_v4 = vld [vmem:[%s2802_s16 + $0x710] sm:$0xff]  ;;  %v589_v8 = vld [vmem:[%s2802_s16 + $0x6a8] sm:$0xff]  ;;  %v646_v9 = vcombine.high %v3047_v61, %v3047_v61 }
  0xe9   : > { %861 = vmatmul.mubr.f32.vlgmr.msra.gmra.mrb[2].mxu0 %v2921_v23  ;;  %v509_v23 = vld [vmem:[%s2802_s16 + $0x428] sm:$0xff]  ;;  %v603_v6 = vld [vmem:[%s2802_s16 + $0x718] sm:$0xff]  ;;  %v620_v10 = vld [vmem:[%s2802_s16 + $0x7a0] sm:$0xff] }
  0xea   : > { %2046 = vmatpush3.bf16.msra.mxu0 %v2045_v24  ;;  %931 = vmatmul.mubr.f32.vlgmr.msra.gmra.mrb[2].mxu1 %v2926_v26  ;;  %v558_v26 = vld [vmem:[%s2802_s16 + $0x5b0] sm:$0xff]  ;;  %v2053_v51 = vpack.c.bf16 %v509_v23, %v508_v44  ;;  %v2065_v24 = vpack.c.bf16 %v515_v15, %v514_v14  ;;  %v2145_v14 = vpack.c.bf16 %v603_v6, %v602_v4  ;;  %v605_v19 = vld [vmem:[%s2802_s16 + $0x728] sm:$0xff]  ;;  %v591_v21 = vld [vmem:[%s2802_s16 + $0x6b8] sm:$0xff] }
  0xeb   : > { %2078 = vmatpush3.bf16.msra.mxu1 %v2077_v28  ;;  %2048 = vmatprep.subr.bf16.mxu0 %v2047_v29  ;;  %v2087_v57 = vpack.c.bf16 %v559_v50, %v558_v26  ;;  %v516_v28 = vld [vmem:[%s2802_s16 + $0x460] sm:$0xff]  ;;  %v517_v29 = vld [vmem:[%s2802_s16 + $0x468] sm:$0xff]  ;;  %v550_v44 = vld [vmem:[%s2802_s16 + $0x570] sm:$0xff]  ;;  %v2115_v15 = vpack.c.bf16 %v589_v8, %v588_v7 }
  0xec   : > { %2080 = vmatprep.subr.bf16.mxu1 %v2079_v33  ;;  %1000 = vmatprep.mubr.f32.mxu0 %v644_v36  ;;  %v549_v33 = vld [vmem:[%s2802_s16 + $0x568] sm:$0xff]  ;;  %v566_v36 = vld [vmem:[%s2802_s16 + $0x5f0] sm:$0xff]  ;;  %v2069_v39 = vpack.c.bf16 %v517_v29, %v516_v28  ;;  %v2105_v50 = vpack.c.bf16 %v551_v45, %v550_v44  ;;  %v623_v22 = vld [vmem:[%s2802_s16 + $0x7b8] sm:$0xff] }
  0xed   : > { %1070 = vmatprep.mubr.f32.mxu1 %v645_v40  ;;  %v2101_v40 = vpack.c.bf16 %v549_v33, %v548_v30  ;;  %v2103_v23 = vpack.c.bf16 %v567_v38, %v566_v36  ;;  %v590_v20 = vld [vmem:[%s2802_s16 + $0x6b0] sm:$0xff]  ;;  %v575_v29 = vld [vmem:[%s2802_s16 + $0x638] sm:$0xff]  ;;  %v624_v36 = vld [vmem:[%s2802_s16 + $0x7c0] sm:$0xff] }
  0xee   : > { %2050 = vmatpush3.bf16.msra.mxu0 %v2049_v41  ;;  %v2071_v41 = vpack.c.bf16 %v535_v35, %v534_v34  ;;  %v574_v28 = vld [vmem:[%s2802_s16 + $0x630] sm:$0xff]  ;;  %v607_v33 = vld [vmem:[%s2802_s16 + $0x738] sm:$0xff]  ;;  %v592_v34 = vld [vmem:[%s2802_s16 + $0x6c0] sm:$0xff] }
  0xef   : > { %2082 = vmatpush3.bf16.msra.mxu1 %v2081_v42  ;;  %2052 = vmatprep.subr.bf16.mxu0 %v2051_v43  ;;  %v518_v42 = vld [vmem:[%s2802_s16 + $0x470] sm:$0xff]  ;;  %v519_v43 = vld [vmem:[%s2802_s16 + $0x478] sm:$0xff]  ;;  %v593_v35 = vld [vmem:[%s2802_s16 + $0x6c8] sm:$0xff] }
  0xf0   : > { %2084 = vmatprep.subr.bf16.mxu1 %v2083_v46  ;;  %v584_v46 = vld [vmem:[%s2802_s16 + $0x680] sm:$0xff]  ;;  %v2073_v26 = vpack.c.bf16 %v519_v43, %v518_v42  ;;  %v606_v30 = vld [vmem:[%s2802_s16 + $0x730] sm:$0xff]  ;;  %v625_v38 = vld [vmem:[%s2802_s16 + $0x7c8] sm:$0xff] }
  0xf1   : > { %v576_v42 = vld [vmem:[%s2802_s16 + $0x640] sm:$0xff]  ;;  %v577_v43 = vld [vmem:[%s2802_s16 + $0x648] sm:$0xff]  ;;  %v626_v48 = vld [vmem:[%s2802_s16 + $0x7d0] sm:$0xff] }
  0xf2   : > { %2054 = vmatpush3.bf16.msra.mxu0 %v2053_v51  ;;  %v2107_v51 = vpack.c.bf16 %v585_v47, %v584_v46  ;;  %v608_v44 = vld [vmem:[%s2802_s16 + $0x740] sm:$0xff]  ;;  %v609_v45 = vld [vmem:[%s2802_s16 + $0x748] sm:$0xff]  ;;  %v594_v46 = vld [vmem:[%s2802_s16 + $0x6d0] sm:$0xff] }
  0xf3   : > { %2086 = vmatpush3.bf16.msra.mxu1 %v2085_v52  ;;  %2056 = vmatprep.subr.bf16.mxu0 %v2055_v53  ;;  %v568_v52 = vld [vmem:[%s2802_s16 + $0x600] sm:$0xff]  ;;  %v569_v53 = vld [vmem:[%s2802_s16 + $0x608] sm:$0xff]  ;;  %v595_v47 = vld [vmem:[%s2802_s16 + $0x6d8] sm:$0xff] }
  0xf4   : > { %2088 = vmatprep.subr.bf16.mxu1 %v2087_v57  ;;  %v586_v57 = vld [vmem:[%s2802_s16 + $0x690] sm:$0xff]  ;;  %v2109_v62 = vpack.c.bf16 %v569_v53, %v568_v52  ;;  %v627_v49 = vld [vmem:[%s2802_s16 + $0x7d8] sm:$0xff]  ;;  %v612_v4 = vld [vmem:[%s2802_s16 + $0x760] sm:$0xff] }
  0xf5   : > { %v578_v52 = vld [vmem:[%s2802_s16 + $0x650] sm:$0xff]  ;;  %v579_v53 = vld [vmem:[%s2802_s16 + $0x658] sm:$0xff]  ;;  %v613_v6 = vld [vmem:[%s2802_s16 + $0x768] sm:$0xff] }
  0xf6   : > { %2058 = vmatpush3.bf16.msra.mxu0 %v2057_v63  ;;  %v3050_v63 = vld [vmem:[%s2795_s17 + $0x38] sm:$0xff]  ;;  %v598_v7 = vld [vmem:[%s2802_s16 + $0x6f0] sm:$0xff] }
  0xf7   : > { %2090 = vmatpush3.bf16.msra.mxu1 %v2089_v0  ;;  %2060 = vmatprep.subr.bf16.mxu0 %v2059_v1  ;;  %v2141_v0 = vpack.c.bf16 %v601_v56, %v600_v54  ;;  %v2111_v1 = vpack.c.bf16 %v587_v58, %v586_v57  ;;  %v610_v54 = vld [vmem:[%s2802_s16 + $0x750] sm:$0xff]  ;;  %v611_v56 = vld [vmem:[%s2802_s16 + $0x758] sm:$0xff]  ;;  %v596_v57 = vld [vmem:[%s2802_s16 + $0x6e0] sm:$0xff] }
  0xf8   : > { %2092 = vmatprep.subr.bf16.mxu1 %v2091_v5  ;;  %v2143_v5 = vpack.c.bf16 %v619_v60, %v618_v59  ;;  %v597_v58 = vld [vmem:[%s2802_s16 + $0x6e8] sm:$0xff]  ;;  %v628_v59 = vld [vmem:[%s2802_s16 + $0x7e0] sm:$0xff]  ;;  %v599_v8 = vld [vmem:[%s2802_s16 + $0x6f8] sm:$0xff] }
  0xf9   : > { %v629_v60 = vld [vmem:[%s2802_s16 + $0x7e8] sm:$0xff] }
  0xfa   : > { %2062 = vmatpush3.bf16.msra.mxu0 %v2061_v11  ;;  %v621_v11 = vld [vmem:[%s2802_s16 + $0x7a8] sm:$0xff] }
  0xfb   : > { %2094 = vmatpush3.bf16.msra.mxu1 %v2093_v12  ;;  %2064 = vmatprep.subr.bf16.mxu0 %v2063_v13  ;;  %v647_v12 = vcombine.high %v3050_v63, %v3050_v63  ;;  %v2113_v13 = vpack.c.bf16 %v571_v3, %v570_v2  ;;  %v2147_v18 = vpack.c.bf16 %v621_v11, %v620_v10  ;;  %v580_v2 = vld [vmem:[%s2802_s16 + $0x660] sm:$0xff]  ;;  %v581_v3 = vld [vmem:[%s2802_s16 + $0x668] sm:$0xff]  ;;  %v631_v10 = vld [vmem:[%s2802_s16 + $0x7f8] sm:$0xff] }
  0xfc   : > { %2096 = vmatprep.subr.bf16.mxu1 %v2095_v17  ;;  %v604_v17 = vld [vmem:[%s2802_s16 + $0x720] sm:$0xff]  ;;  %v2133_v11 = vpack.c.bf16 %v581_v3, %v580_v2  ;;  %v1328_v2 = vld [vmem:[%s3226_s5 + $0x10] sm:$0xff] (!%p1544_p12) }
  0xfe   : > { %2066 = vmatpush3.bf16.msra.mxu0 %v2065_v24 }
  0xff   : > { %2098 = vmatpush3.bf16.msra.mxu1 %v2097_v25  ;;  %2068 = vmatprep.subr.bf16.mxu0 %v2067_v27  ;;  %v2149_v25 = vpack.c.bf16 %v605_v19, %v604_v17  ;;  %v2119_v27 = vpack.c.bf16 %v591_v21, %v590_v20  ;;  %v615_v17 = vld [vmem:[%s2802_s16 + $0x778] sm:$0xff] }
 0x100   : > { %2100 = vmatprep.subr.bf16.mxu1 %v2099_v31 }
 0x102   : > { %2070 = vmatpush3.bf16.msra.mxu0 %v2069_v39  ;;  %v2121_v39 = vpack.c.bf16 %v575_v29, %v574_v28 }
 0x103   : > { %2102 = vmatpush3.bf16.msra.mxu1 %v2101_v40  ;;  %2072 = vmatprep.subr.bf16.mxu0 %v2071_v41  ;;  %v2153_v40 = vpack.c.bf16 %v607_v33, %v606_v30  ;;  %v2123_v41 = vpack.c.bf16 %v593_v35, %v592_v34 }
 0x104   : > { %2104 = vmatprep.subr.bf16.mxu1 %v2103_v23  ;;  %v2155_v23 = vpack.c.bf16 %v625_v38, %v624_v36 }
 0x106   : > { %2074 = vmatpush3.bf16.msra.mxu0 %v2073_v26  ;;  %v2125_v26 = vpack.c.bf16 %v577_v43, %v576_v42 }
 0x107   : > { %2106 = vmatpush3.bf16.msra.mxu1 %v2105_v50  ;;  %2108 = vmatprep.subr.bf16.mxu0 %v2107_v51  ;;  %v2157_v50 = vpack.c.bf16 %v609_v45, %v608_v44  ;;  %v2127_v51 = vpack.c.bf16 %v595_v47, %v594_v46 }
 0x108   : > { %2140 = vmatprep.subr.bf16.mxu1 %v2139_v55  ;;  %v2159_v55 = vpack.c.bf16 %v627_v49, %v626_v48 }
 0x109   : > { %1001 = vmatmul.mubr.f32.vlgmr.msra.gmra.mrb[4].mxu0 %v2975_v32  ;;  %v573_v32 = vld [vmem:[%s2802_s16 + $0x628] sm:$0xff] }
 0x10a   : > { %2110 = vmatpush3.bf16.msra.mxu0 %v2109_v62  ;;  %1071 = vmatmul.mubr.f32.vlgmr.msra.gmra.mrb[4].mxu1 %v2982_v37  ;;  %v622_v37 = vld [vmem:[%s2802_s16 + $0x7b0] sm:$0xff]  ;;  %v2117_v24 = vpack.c.bf16 %v573_v32, %v572_v16  ;;  %v2129_v62 = vpack.c.bf16 %v579_v53, %v578_v52  ;;  %v1232_v52 = vld [vmem:[%s3224_s3] sm:$0xff] (!%p1544_p12)  ;;  %v1233_v53 = vld [vmem:[%s3224_s3 + $0x8] sm:$0xff] (!%p1544_p12) }
 0x10b   : > { %2142 = vmatpush3.bf16.msra.mxu1 %v2141_v0  ;;  %2112 = vmatprep.subr.bf16.mxu0 %v2111_v1  ;;  %v2151_v31 = vpack.c.bf16 %v623_v22, %v622_v37  ;;  %v2161_v0 = vpack.c.bf16 %v611_v56, %v610_v54  ;;  %v2131_v1 = vpack.c.bf16 %v597_v58, %v596_v57  ;;  %v614_v32 = vld [vmem:[%s2802_s16 + $0x770] sm:$0xff]  ;;  %v2535_v58 = vmov (!%p1544_p12), 0.0  }
 0x10c   : > { %2144 = vmatprep.subr.bf16.mxu1 %v2143_v5  ;;  %1140 = vmatprep.mubr.f32.mxu0 %v646_v9  ;;  %v2163_v5 = vpack.c.bf16 %v629_v60, %v628_v59  ;;  %v630_v9 = vld [vmem:[%s2802_s16 + $0x7f0] sm:$0xff]  ;;  %v2169_v19 = vpack.c.bf16 %v615_v17, %v614_v32  ;;  %v2172_v56 = vpack.c.bf16 (!%p1544_p12), %v1233_v53, %v1232_v52  ;;  %v1236_v60 = vld [vmem:[%s3224_s3 + $0x20] sm:$0xff] (!%p1544_p12) }
 0x10d   : > { %1210 = vmatprep.mubr.f32.mxu1 %v647_v12  ;;  %v2165_v12 = vpack.c.bf16 %v613_v6, %v612_v4  ;;  %v2167_v16 = vpack.c.bf16 %v631_v10, %v630_v9  ;;  %v1234_v54 = vld [vmem:[%s3224_s3 + $0x10] sm:$0xff] (!%p1544_p12)  ;;  %v1235_v57 = vld [vmem:[%s3224_s3 + $0x18] sm:$0xff] (!%p1544_p12)  ;;  %v1330_v9 = vld [vmem:[%s3226_s5 + $0x20] sm:$0xff] (!%p1544_p12) }
 0x10e   : > { %2114 = vmatpush3.bf16.msra.mxu0 %v2113_v13  ;;  %v2135_v13 = vpack.c.bf16 %v599_v8, %v598_v7  ;;  %v2175_v59 = vpack.c.bf16 (!%p1544_p12), %v1235_v57, %v1234_v54  ;;  %v1238_v6 = vld [vmem:[%s3224_s3 + $0x30] sm:$0xff] (!%p1544_p12)  ;;  %v1239_v7 = vld [vmem:[%s3224_s3 + $0x38] sm:$0xff] (!%p1544_p12)  ;;  %v1331_v10 = vld [vmem:[%s3226_s5 + $0x28] sm:$0xff] (!%p1544_p12) }
 0x10f   : > { %2146 = vmatpush3.bf16.msra.mxu1 %v2145_v14  ;;  %2116 = vmatprep.subr.bf16.mxu0 %v2115_v15  ;;  %v582_v14 = vld [vmem:[%s2802_s16 + $0x670] sm:$0xff]  ;;  %v583_v15 = vld [vmem:[%s2802_s16 + $0x678] sm:$0xff] }
 0x110   : > { %2148 = vmatprep.subr.bf16.mxu1 %v2147_v18  ;;  %v2137_v18 = vpack.c.bf16 %v583_v15, %v582_v14  ;;  %v2202_v14 = vpack.c.bf16 (!%p1544_p12), %v1331_v10, %v1330_v9  ;;  %v1243_v32 = vld [vmem:[%s3224_s3 + $0x58] sm:$0xff] (!%p1544_p12) }
 0x112   : > { %2118 = vmatpush3.bf16.msra.mxu0 %v2117_v24 }
 0x113   : > { %2150 = vmatpush3.bf16.msra.mxu1 %v2149_v25  ;;  %2120 = vmatprep.subr.bf16.mxu0 %v2119_v27 }
 0x114   : > { %2152 = vmatprep.subr.bf16.mxu1 %v2151_v31 }
 0x116   : > { %2122 = vmatpush3.bf16.msra.mxu0 %v2121_v39 }
 0x117   : > { %2154 = vmatpush3.bf16.msra.mxu1 %v2153_v40  ;;  %2124 = vmatprep.subr.bf16.mxu0 %v2123_v41 }
 0x118   : > { %2156 = vmatprep.subr.bf16.mxu1 %v2155_v23 }
 0x11a   : > { %2126 = vmatpush3.bf16.msra.mxu0 %v2125_v26  ;;  %v367_v26 = vld [vmem:[#allocation2] sm:$0xf] }
 0x11b   : > { %2158 = vmatpush3.bf16.msra.mxu1 %v2157_v50  ;;  %2128 = vmatprep.subr.bf16.mxu0 %v2127_v51 }
 0x11c   : > { %2160 = vmatprep.subr.bf16.mxu1 %v2159_v55  ;;  %v2533_v55 = vmov (!%p1544_p12), 0.0|0.0  }
 0x11e   : > { %2130 = vmatpush3.bf16.msra.mxu0 %v2129_v62  ;;  %v1237_v62 = vld [vmem:[%s3224_s3 + $0x28] sm:$0xff] (!%p1544_p12) }
 0x11f   : > { %2162 = vmatpush3.bf16.msra.mxu1 %v2161_v0  ;;  %2132 = vmatprep.subr.bf16.mxu0 %v2131_v1  ;;  %v1326_v0 = vld [vmem:[%s3226_s5] sm:$0xff] (!%p1544_p12)  ;;  %v1327_v1 = vld [vmem:[%s3226_s5 + $0x8] sm:$0xff] (!%p1544_p12)  ;;  %v2178_v3 = vpack.c.bf16 (!%p1544_p12), %v1237_v62, %v1236_v60 }
 0x120   : > { %2164 = vmatprep.subr.bf16.mxu1 %v2163_v5  ;;  %v2196_v4 = vpack.c.bf16 (!%p1544_p12), %v1327_v1, %v1326_v0  ;;  %v1329_v5 = vld [vmem:[%s3226_s5 + $0x18] sm:$0xff] (!%p1544_p12) }
 0x121   : > { %v2199_v8 = vpack.c.bf16 (!%p1544_p12), %v1329_v5, %v1328_v2 }
 0x122   : > { %2134 = vmatpush3.bf16.msra.mxu0 %v2133_v11  ;;  %v2181_v11 = vpack.c.bf16 (!%p1544_p12), %v1239_v7, %v1238_v6 }
 0x123   : > { %2166 = vmatpush3.bf16.msra.mxu1 %v2165_v12  ;;  %2136 = vmatprep.subr.bf16.mxu0 %v2135_v13  ;;  %v1240_v12 = vld [vmem:[%s3224_s3 + $0x40] sm:$0xff] (!%p1544_p12)  ;;  %v1241_v13 = vld [vmem:[%s3224_s3 + $0x48] sm:$0xff] (!%p1544_p12) }
 0x124   : > { %2168 = vmatprep.subr.bf16.mxu1 %v2167_v16  ;;  %v2184_v15 = vpack.c.bf16 (!%p1544_p12), %v1241_v13, %v1240_v12  ;;  %v1242_v16 = vld [vmem:[%s3224_s3 + $0x50] sm:$0xff] (!%p1544_p12) }
 0x125   : > { %v2187_v17 = vpack.c.bf16 (!%p1544_p12), %v1243_v32, %v1242_v16 }
 0x126   : > { %2138 = vmatpush3.bf16.msra.mxu0 %v2137_v18  ;;  %v1244_v18 = vld [vmem:[%s3224_s3 + $0x60] sm:$0xff] (!%p1544_p12) }
 0x127   : > { %2170 = vmatpush3.bf16.msra.mxu1 %v2169_v19  ;;  %2171 = vmatprep.subr.bf16.mxu0 (!%p1544_p12), %v2533_v55  ;;  %v1245_v19 = vld [vmem:[%s3224_s3 + $0x68] sm:$0xff] (!%p1544_p12) }
 0x128   : > { %2195 = vmatprep.subr.bf16.mxu1 (!%p1544_p12), %v2533_v55 }
 0x129   : > { %1141 = vmatmul.mubr.f32.vlgmr.msra.gmra.mrb[6].mxu0 %v3047_v61 }
 0x12a   : > { %1211 = vmatmul.mubr.f32.vlgmr.msra.gmra.mrb[6].mxu1 %v3050_v63  ;;  %1893 = vmatprep.mubr.msk.f32.mxu0 (!%p1544_p12), %vm2534_vm0, %v2535_v58 }
 0x12b   : > { %1912 = vmatprep.mubr.msk.f32.mxu1 (!%p1544_p12), %vm2534_vm0, %v2535_v58  ;;  %2173 = vmatpush3.bf16.msra.mxu0 (!%p1544_p12), %v2172_v56 }
 0x12c   : > { %2174 = vmatprep.subr.bf16.mxu0 (!%p1544_p12), %v2533_v55  ;;  %2197 = vmatpush3.bf16.msra.mxu1 (!%p1544_p12), %v2196_v4 }
 0x12d   : > { %2198 = vmatprep.subr.bf16.mxu1 (!%p1544_p12), %v2533_v55 }
 0x12f   : > { %2176 = vmatpush3.bf16.msra.mxu0 (!%p1544_p12), %v2175_v59 }
 0x130   : > { %2177 = vmatprep.subr.bf16.mxu0 (!%p1544_p12), %v2533_v55  ;;  %2200 = vmatpush3.bf16.msra.mxu1 (!%p1544_p12), %v2199_v8 }
 0x131   : > { %2201 = vmatprep.subr.bf16.mxu1 (!%p1544_p12), %v2533_v55 }
 0x133   : > { %2179 = vmatpush3.bf16.msra.mxu0 (!%p1544_p12), %v2178_v3 }
 0x134   : > { %2180 = vmatprep.subr.bf16.mxu0 (!%p1544_p12), %v2533_v55  ;;  %2203 = vmatpush3.bf16.msra.mxu1 (!%p1544_p12), %v2202_v14 }
 0x135   : > { %2204 = vmatprep.subr.bf16.mxu1 (!%p1544_p12), %v2533_v55 }
 0x137   : > { %2182 = vmatpush3.bf16.msra.mxu0 (!%p1544_p12), %v2181_v11 }
 0x138   : > { %2183 = vmatprep.subr.bf16.mxu0 (!%p1544_p12), %v2533_v55 }
 0x13b   : > { %2185 = vmatpush3.bf16.msra.mxu0 (!%p1544_p12), %v2184_v15 }
 0x13c   : > { %2186 = vmatprep.subr.bf16.mxu0 (!%p1544_p12), %v2533_v55 }
 0x13f   : > { %2188 = vmatpush3.bf16.msra.mxu0 (!%p1544_p12), %v2187_v17 }
 0x140   : > { %2189 = vmatprep.subr.bf16.mxu0 (!%p1544_p12), %v2533_v55 }
 0x19c   : > { %v1587_v20 = vpop.f32.mrb[0].mxu0 }
 0x19d   : > { %v1622_v21 = vpop.f32.mrb[0].mxu1  ;;  %v1588_v37 = vpop.f32.mrb[1].mxu0 }
 0x19e   : > { %v1589_v22 = vadd.f32 %v1588_v37, %v1587_v20  ;;  %v1623_v24 = vpop.f32.mrb[1].mxu1  ;;  %v2190_v20 = vpack.c.bf16 (!%p1544_p12), %v1245_v19, %v1244_v18  ;;  %v1545_v37 = vld [vmem:[#allocation8] ss:$0 sm:$0xff] (!%p1544_p12) }
 0x19f   : > { %v1624_v25 = vadd.f32 %v1623_v24, %v1622_v21  ;;  %v1247_v24 = vld [vmem:[%s3224_s3 + $0x78] sm:$0xff] (!%p1544_p12) }
 0x1a0   : > { %2191 = vmatpush3.bf16.msra.mxu0 (!%p1544_p12), %v2190_v20 }
 0x1a1   : > { %v793_v27 = vadd.f32 %v1624_v25, %v1589_v22  ;;  %v1246_v22 = vld [vmem:[%s3224_s3 + $0x70] sm:$0xff] (!%p1544_p12)  ;;  %2192 = vmatprep.subr.bf16.mxu0 (!%p1544_p12), %v2533_v55 }
 0x1bc   : > { %v1657_v28 = vpop.f32.mrb[2].mxu0 }
 0x1bd   : > { %v1658_v29 = vpop.f32.mrb[3].mxu0  ;;  %v1692_v30 = vpop.f32.mrb[2].mxu1 }
 0x1be   : > { %v1659_v31 = vadd.f32 %v1658_v29, %v1657_v28  ;;  %v1693_v33 = vpop.f32.mrb[3].mxu1  ;;  %v1332_v29 = vld [vmem:[%s3226_s5 + $0x30] sm:$0xff] (!%p1544_p12) }
 0x1bf   : > { %v1694_v34 = vadd.f32 %v1693_v33, %v1692_v30  ;;  %v1333_v30 = vld [vmem:[%s3226_s5 + $0x38] sm:$0xff] (!%p1544_p12)  ;;  %v1546_v33 = vld [vmem:[#allocation9] ss:$0 sm:$0xff] (!%p1544_p12) }
 0x1c0   : > { %v863_v35 = vadd.f32 %v1659_v31, %v793_v27  ;;  %v2193_v27 = vpack.c.bf16 (!%p1544_p12), %v1247_v24, %v1246_v22  ;;  %v2205_v31 = vpack.c.bf16 (!%p1544_p12), %v1333_v30, %v1332_v29 }
 0x1c2   : > { %v933_v36 = vadd.f32 %v1694_v34, %v863_v35  ;;  %2194 = vmatpush3.bf16.msra.mxu0 (!%p1544_p12), %v2193_v27  ;;  %2206 = vmatpush3.bf16.msra.mxu1 (!%p1544_p12), %v2205_v31 }
 0x1dc   : > { %v1727_v38 = vpop.f32.mrb[4].mxu0 }
 0x1dd   : > { %v1728_v39 = vpop.f32.mrb[5].mxu0  ;;  %v1762_v61 = vpop.f32.mrb[4].mxu1 }
 0x1de   : > { %v1729_v40 = vadd.f32 %v1728_v39, %v1727_v38  ;;  %v1763_v63 = vpop.f32.mrb[5].mxu1  ;;  %v1547_v39 = vld [vmem:[#allocation11] ss:$0 sm:$0xff] (!%p1544_p12) }
 0x1df   : > { %v1764_v41 = vadd.f32 %v1763_v63, %v1762_v61 }
 0x1e0   : > { %v1003_v42 = vadd.f32 %v1729_v40, %v933_v36 }
 0x1e2   : > { %v1073_v43 = vadd.f32 %v1764_v41, %v1003_v42 }
 0x1fc   : > { %v1797_v44 = vpop.f32.mrb[6].mxu0 }
 0x1fd   : > { %v1798_v23 = vpop.f32.mrb[7].mxu0  ;;  %v1832_v45 = vpop.f32.mrb[6].mxu1 }
 0x1fe   : > { %v1799_v46 = vadd.f32 %v1798_v23, %v1797_v44  ;;  %v1833_v47 = vpop.f32.mrb[7].mxu1 }
 0x1ff   : > { %v1834_v48 = vadd.f32 %v1833_v47, %v1832_v45 }
 0x200   : > { %v1143_v49 = vadd.f32 %v1799_v46, %v1073_v43  ;;  %1221 = sbr.rel (%p1544_p12) target bundleno = 961 (0x3c1), region = 76 }
 0x202   : > { %v1213_v50 = vadd.f32 %v1834_v48, %v1143_v49 }
 0x204   : > { %v1216_v51 = vadd.f32 %v1213_v50, %v367_v26 }
 0x206   : > { %1217 = vst [vmem:[#allocation2] sm:$0xf] %v1216_v51 }
 0x20d   : > { %v1222_v21 = vld [vmem:[#allocation2] sm:$0xf] }
 0x20e   : > { %v1230_v25 = vadd.f32 %v1545_v37, %v1222_v21 }
 0x210   : > { %v1231_v28 = vmax.f32 %v1230_v25, 0.0 }
 0x212   : > { %1894 = vmatmul.mubr.f32.vlgmr.msra.gmra.mrb[0].mxu0 %v1231_v28 }
 0x2e5   : > { %v1321_v34 = vpop.f32.mrb[0].mxu0 }
 0x2e6   : > { %v1322_v35 = vadd.f32 %v1546_v33, %v1321_v34  ;;  %v1895_v36 = vpop.f32.mrb[1].mxu0 }
 0x2e8   : > { %v1325_v38 = vmax.f32 %v1322_v35, 0.0 }
 0x2ea   : > { %1913 = vmatmul.mubr.msk.f32.vlgmr.msra.gmra.mrb[0].mxu1 %vm1341_vm1, %v1325_v38 }
 0x3bd   : > { %v1411_v61 = vpop.f32.mrb[0].mxu1 }
 0x3be   : > { %v1412_v40 = vadd.f32 %v1547_v39, %v1411_v61  ;;  %v1914_v63 = vpop.f32.mrb[1].mxu1 }
 0x3c0   : > { %1416 = vst.msk [vmem:[#allocation12] sm:$0xf] %vm1415_vm2, %v1412_v40 }
 0x3c1 PF: > { %p2251_p0 = scmp.eq.s32.totalorder %s2596_s28, 3  ;;  %s2536_s15 = smov [#allocation12]  }
 0x3c2   : > { %s1424_s17 = sshll.u32 %s2536_s15, 4  ;;  %s1425_s17 = int_to_ptr.vmem [resolvable:$true] %s1424_s17 }
 0x3c3   : > { %s2447_s11 = scalar_lea.vmem %s1425_s17, 64  ;;  %p2454_p10 = scmp.lt.s32.totalorder %s1425_s17, %s1425_s17 }
 0x3c4   : > { %p2448_p2 = scmp.ne.s32.totalorder %s1425_s17, %s2447_s11  ;;  %p2455_p9 = scmp.lt.s32.totalorder %s2447_s11, %s2447_s11 }
 0x3c6   : > { %p2449_p13 = pnand %p2448_p2, %p2251_p0  ;;  %p2456_p6 = por %p2455_p9, %p2454_p10 }
 0x3c8   : > { %p2450_p3 = pneg %p2449_p13 }
 0x3ca   : > { %p2457_p7 = pnand %p2456_p6, %p2450_p3 }
 0x3cc   : > { %2460 = shalt.err (!%p2457_p7)
}
 0x3cd   : > { %s2461_s16 = scalar_lea.hbm %s3228_s7, 64 }
 0x3ce   : > { %p2462_p8 = scmp.ne.s32.totalorder %s3228_s7, %s2461_s16  ;;  %p2467_p4 = scmp.lt.u32.totalorder %s2461_s16, %s3228_s7 }
 0x3d0   : > { %p2463_p11 = pnand %p2462_p8, %p2251_p0 }
 0x3d2   : > { %p2464_p1 = pneg %p2463_p11 }
 0x3d4   : > { %p2469_p5 = pnand %p2467_p4, %p2464_p1 }
 0x3d6   : > { %2472 = shalt.err (!%p2469_p5)
}
 0x3d7   : > { %2224 = dma.vmem_to_hbm [thread:$0]  (%p2251_p0), %s1425_s17, 64, %s3228_s7, [#allocation5]  }
 0x3d8   : > { %2506 = dma.done.wait (%p2251_p0), [#allocation5], 64  }
 0x3d9   : > { %2508 = vsyncadd (%p2251_p0), [#allocation5], 4294967232 }
 0x3da PF: > { %p22_p12 = scmp.ge.s32.totalorder %s2698_s20, 6   ;;  %s3244_s24 = smov %s2515_s25 }
 0x3db   : > { %s3245_s25 = smov %s2519_s26  ;;  %s3246_s26 = smov %s2708_s23 }
 0x3dc   : > { %s3247_s27 = smov %s2698_s20  ;;  %24 = sbr.rel (!%p22_p12) target bundleno = 7 (0x7), region = 118 }
 0x3e3   :  { %1437 = vsyncpa [#allocation4], 1 }
 0x3e4   :  { %1439 = vsyncpa [#allocation4 + $0x1], 1 }
 0x3e5   :  { %1440 = vsyncpa [#allocation7], 1 }
 0x3e6   :  { %1442 = vsyncpa [#allocation7 + $0x1], 1 }
 0x3e7   :  { %1443 = vsyncpa [#allocation10], 1 }
 0x3e8   :  { %1444 = vsyncpa [#allocation5], 1 }
 0x3e9   :  { %1446 = vsyncpa [#allocation5 + $0x1], 1 }

</bundles_post_ra>
